<compile_context>
chip_gen: v7x
topology: tpu7x:2x2x1
jax: 0.10.0
libtpu: 0.0.40
codegen_flags: <defaults>
</compile_context>

<pallas_src>
import functools

import jax
import jax.numpy as jnp
from jax.experimental import pallas as pl
from jax.experimental.pallas import tpu as pltpu

HEADS = 6
NEG_SLOPE = 0.2               # GATConv default LeakyReLU slope


def _mm(a, b):
    """MXU matmul, f32 operands + f32 accumulation (tiny shapes -> latency-bound)."""
    return jnp.dot(a, b, preferred_element_type=jnp.float32)


# ---------------------------------------------------------------------------
# Fused kernel: GATConv1 -> ELU -> GATConv2 -> Linear   (lane-dense heads)
# ---------------------------------------------------------------------------
def fused_gatcn_kernel(x_ref, adj_ref,
                       w1_ref, d1_ref, s1_ref, m1_ref, b1_ref,
                       w2_ref, d2_ref, s2_ref, m2_ref, b2_ref,
                       segb_ref, wl_ref, bl_ref,
                       out_ref, h_ref, *, heads):
    """All operands are full VMEM-resident blocks.

    x_ref   : [N, Fin]        node features
    adj_ref : [N, N] int8     adj[i, j] = 1 if edge j -> i (incl. self loops)
    w*_ref  : [Fin_l, H*C_l]  batched per-head linear transform (lane-dense)
    d*_ref  : [H*C_l, H*N]    dst-score expansion (block-replicated a_dst)
    s*_ref  : [H*C_l, H]      block-diag src-score projection
    m*_ref  : [H*N, H*C_l]    0/1 block mask   kron(I_H, 1_{N x C_l})
    b*_ref  : [1, H*C_l]      concat bias
    segb_ref: [H*N, H*N]      0/1 block-ones   kron(I_H, 1_{N x N})
    wl_ref  : [H*C2, K]       final linear weight,  bl_ref: [1, K]
    out_ref : [N, K]          logits
    h_ref   : [N, H*C2]       second GATConv output (returned as `h`)
    """
    x = x_ref[...]
    adj_f = adj_ref[...].astype(jnp.float32)                       # int8 -> f32, tiny [N,N]
    # Edge mask replicated lane-dense across heads: [N, H*N]. Layer-invariant.
    edge = jnp.concatenate([adj_f] * heads, axis=1) > 0.0
    segb = segb_ref[...]

    def gat_layer(feat, w, d, s, bmask, b):
        # Batched per-head transform: one lane-dense matmul.
        xh = _mm(feat, w)                                           # [N, H*c]
        # Lane-dense attention scores for all heads: e[i, h*N + j].
        dst = _mm(xh, d)                                            # [N, H*N]  (MXU)
        q = _mm(xh, s)                                              # [N, H] per-head src scores
        qt = q.T                                                    # [H, N] (one tiny transpose)
        src_row = jnp.concatenate(                                  # [1, H*N] broadcast row
            [qt[h:h + 1, :] for h in range(heads)], axis=1)
        e = dst + src_row                                           # dst[i,h] + src[j,h]
        e = jnp.where(e > 0.0, e, NEG_SLOPE * e)                    # LeakyReLU (slab)
        e = jnp.where(edge, e, -1e30)                               # inline edge mask (slab)
        # Softmax per (row, head-segment).  A single per-row max is a valid
        # stabilizer for every segment (softmax is shift-invariant per row).
        m = jnp.max(e, axis=-1, keepdims=True)                      # [N, 1]
        p = jnp.exp(e - m)                                          # slab EUP; masked -> 0
        denom = _mm(p, segb)                                        # per-segment sums, pre-broadcast
        alpha = p * pl.reciprocal(denom, approx=True)               # slab
        # Aggregation: one MXU matmul against block-diag(xh) = tile(xh) * mask.
        bdxh = jnp.concatenate([xh] * heads, axis=0) * bmask        # [H*N, H*c]
        return _mm(alpha, bdxh) + b                                 # [N, H*c]

    # --- layer 1 (head width padded 30 -> 32 on host; padding stays exactly 0) ---
    y1 = gat_layer(x, w1_ref[...], d1_ref[...], s1_ref[...], m1_ref[...], b1_ref[...])
    # ELU (after bias, matching PyG).  ELU(0) = 0 keeps padded channels at 0.
    y1 = jnp.where(y1 > 0.0, y1, jnp.exp(jnp.minimum(y1, 0.0)) - 1.0)

    # --- layer 2 ---
    h = gat_layer(y1, w2_ref[...], d2_ref[...], s2_ref[...], m2_ref[...], b2_ref[...])
    h_ref[...] = h

    # --- final linear ---
    out_ref[...] = _mm(h, wl_ref[...]) + bl_ref[...]


# ---------------------------------------------------------------------------
# Wrapper
# ---------------------------------------------------------------------------
def my_gatcn_forward(x, adj, fused):
    """Eval-mode forward of MyGATCN as one fused Pallas kernel. Returns (out, h)."""
    n = x.shape[0]
    hdim = fused["w2"].shape[-1]                 # heads * num_hidden
    k = fused["wl"].shape[-1]

    kern = functools.partial(fused_gatcn_kernel, heads=HEADS)
    args = (x, adj,
            fused["w1"], fused["d1"], fused["s1"], fused["m1"], fused["b1"],
            fused["w2"], fused["d2"], fused["s2"], fused["m2"], fused["b2"],
            fused["segb"], fused["wl"], fused["bl"])
    in_specs = [pl.BlockSpec(a.shape, lambda i: (0, 0)) for a in args]  # all 2-D

    out, h = pl.pallas_call(
        kern,
        grid=(1,),
        in_specs=in_specs,
        out_specs=(pl.BlockSpec((n, k), lambda i: (0, 0)),
                   pl.BlockSpec((n, hdim), lambda i: (0, 0))),
        out_shape=(jax.ShapeDtypeStruct((n, k), jnp.float32),
                   jax.ShapeDtypeStruct((n, hdim), jnp.float32)),
        compiler_params=pltpu.CompilerParams(
            dimension_semantics=("arbitrary",)),
    )(*args)
    return out, h


# ---------------------------------------------------------------------------
# Parameter construction + host-side repacking for the fused kernel
# ---------------------------------------------------------------------------
def make_params(key, num_features, num_hidden, num_classes, heads):
    c1 = 30
    ks = jax.random.split(key, 9)
    s = 0.1
    return {
        # conv1: in=num_features, out=30, heads
        "w1": s * jax.random.normal(ks[0], (heads, num_features, c1), jnp.float32),
        "as1": s * jax.random.normal(ks[1], (heads, c1), jnp.float32),
        "ad1": s * jax.random.normal(ks[2], (heads, c1), jnp.float32),
        "b1": s * jax.random.normal(ks[3], (heads, c1), jnp.float32),
        # conv2: in=heads*30, out=num_hidden, heads
        "w2": s * jax.random.normal(ks[4], (heads, heads * c1, num_hidden), jnp.float32),
        "as2": s * jax.random.normal(ks[5], (heads, num_hidden), jnp.float32),
        "ad2": s * jax.random.normal(ks[6], (heads, num_hidden), jnp.float32),
        "b2": s * jax.random.normal(ks[7], (heads, num_hidden), jnp.float32),
        # linear: num_hidden*heads -> num_classes
        "wl": s * jax.random.normal(ks[8], (num_hidden * heads, num_classes), jnp.float32),
        "bl": jnp.zeros((1, num_classes), jnp.float32),
    }


def _src_blockdiag(a_src):
    """[H, C] src attention vectors -> S: [H*C, H],  S[h*C+f, h] = a_src[h, f]."""
    heads, c = a_src.shape
    s = jnp.zeros((heads * c, heads), jnp.float32)
    for h in range(heads):
        s = s.at[h * c:(h + 1) * c, h].set(a_src[h])
    return s


def _dst_expand(a_dst, n):
    """[H, C] dst attention vectors -> D: [H*C, H*N],  D[h*C+f, h*N+j] = a_dst[h, f]."""
    heads, c = a_dst.shape
    d = jnp.zeros((heads * c, heads * n), jnp.float32)
    for h in range(heads):
        d = d.at[h * c:(h + 1) * c, h * n:(h + 1) * n].set(
            jnp.broadcast_to(a_dst[h][:, None], (c, n)))
    return d


def prepare_fused_params(p, heads, num_hidden, num_nodes):
    """Repack per-head PyTorch-style params into lane-dense fused-kernel operands."""
    n = num_nodes
    fin = p["w1"].shape[1]
    c1 = p["w1"].shape[-1]                       # 30
    c1p = ((c1 + 7) // 8) * 8                    # 32 (aligned per-head width)
    pad1 = c1p - c1

    # Layer 1: pad head width 30 -> 32 (padded channels stay exactly 0 end-to-end).
    w1 = jnp.pad(p["w1"], ((0, 0), (0, 0), (0, pad1)))                  # [H, Fin, c1p]
    w1_all = jnp.transpose(w1, (1, 0, 2)).reshape(fin, heads * c1p)     # [Fin, H*c1p]
    as1 = jnp.pad(p["as1"], ((0, 0), (0, pad1)))
    ad1 = jnp.pad(p["ad1"], ((0, 0), (0, pad1)))
    b1 = jnp.pad(p["b1"], ((0, 0), (0, pad1))).reshape(1, heads * c1p)
    d1 = _dst_expand(ad1, n)                                            # [H*c1p, H*N]
    s1 = _src_blockdiag(as1)                                            # [H*c1p, H]
    m1 = jnp.kron(jnp.eye(heads, dtype=jnp.float32),
                  jnp.ones((n, c1p), jnp.float32))                      # [H*N, H*c1p]

    # Layer 2: flatten per-head weights to one lane-dense matmul; remap input rows
    # to the padded (h1*c1p + c) indexing (padded rows = 0).
    c2 = num_hidden
    w2 = jnp.transpose(p["w2"], (1, 0, 2)).reshape(heads * c1, heads * c2)
    w2 = w2.reshape(heads, c1, heads * c2)
    w2 = jnp.pad(w2, ((0, 0), (0, pad1), (0, 0))).reshape(heads * c1p, heads * c2)
    d2 = _dst_expand(p["ad2"], n)                                       # [H*c2, H*N]
    s2 = _src_blockdiag(p["as2"])                                       # [H*c2, H]
    m2 = jnp.kron(jnp.eye(heads, dtype=jnp.float32),
                  jnp.ones((n, c2), jnp.float32))                       # [H*N, H*c2]
    b2 = p["b2"].reshape(1, heads * c2)

    segb = jnp.kron(jnp.eye(heads, dtype=jnp.float32),
                    jnp.ones((n, n), jnp.float32))                      # [H*N, H*N]

    return {"w1": w1_all, "d1": d1, "s1": s1, "m1": m1, "b1": b1,
            "w2": w2, "d2": d2, "s2": s2, "m2": m2, "b2": b2,
            "segb": segb, "wl": p["wl"], "bl": p["bl"]}


def build_adjacency(edge_index, num_nodes):
    """int8 adjacency: adj[i, j] = 1 iff edge j -> i (plus self loops)."""
    src = edge_index[0]
    dst = edge_index[1]
    adj = jnp.zeros((num_nodes, num_nodes), jnp.int8).at[dst, src].set(1)
    # GATConv default add_self_loops=True
    adj = jnp.maximum(adj, jnp.eye(num_nodes, dtype=jnp.int8))
    return adj


if __name__ == "__main__":
    N = 16            # nodes
    NUM_FEATURES = 8
    NUM_HIDDEN = 8
    NUM_CLASSES = 4

    key = jax.random.PRNGKey(0)
    k_x, k_p = jax.random.split(key)

    # node features
    x = jax.random.normal(k_x, (N, NUM_FEATURES), jnp.float32)

    # deterministic ring graph (both directions): edge_index is [2, E]
    idx = jnp.arange(N)
    src = jnp.concatenate([idx, (idx + 1) % N])
    dst = jnp.concatenate([(idx + 1) % N, idx])
    edge_index = jnp.stack([src, dst], axis=0)          # [2, 32]

    adj = build_adjacency(edge_index, N)
    params = make_params(k_p, NUM_FEATURES, NUM_HIDDEN, NUM_CLASSES, HEADS)
    fused = prepare_fused_params(params, HEADS, NUM_HIDDEN, N)

    out, h = my_gatcn_forward(x, adj, fused)
    jax.block_until_ready((out, h))

    assert out.shape == (N, NUM_CLASSES), out.shape
    assert h.shape == (N, NUM_HIDDEN * HEADS), h.shape
    print("KERNEL_OK")
</pallas_src>

<mosaic_0001>
module attributes {stable_mosaic.version = 11 : i64} {
  func.func @fused_gatcn_kernel(%arg0: i32, %arg1: memref<16x8xf32, #tpu.memory_space<vmem>>, %arg2: memref<16x16xi8, #tpu.memory_space<vmem>>, %arg3: memref<8x192xf32, #tpu.memory_space<vmem>>, %arg4: memref<192x96xf32, #tpu.memory_space<vmem>>, %arg5: memref<192x6xf32, #tpu.memory_space<vmem>>, %arg6: memref<96x192xf32, #tpu.memory_space<vmem>>, %arg7: memref<1x192xf32, #tpu.memory_space<vmem>>, %arg8: memref<192x48xf32, #tpu.memory_space<vmem>>, %arg9: memref<48x96xf32, #tpu.memory_space<vmem>>, %arg10: memref<48x6xf32, #tpu.memory_space<vmem>>, %arg11: memref<96x48xf32, #tpu.memory_space<vmem>>, %arg12: memref<1x48xf32, #tpu.memory_space<vmem>>, %arg13: memref<96x96xf32, #tpu.memory_space<vmem>>, %arg14: memref<48x4xf32, #tpu.memory_space<vmem>>, %arg15: memref<1x4xf32, #tpu.memory_space<vmem>>, %arg16: memref<16x4xf32, #tpu.memory_space<vmem>>, %arg17: memref<16x48xf32, #tpu.memory_space<vmem>>) attributes {dimension_semantics = [#tpu.dimension_semantics<arbitrary>], iteration_bounds = array<i64: 1>, scalar_prefetch = 0 : i64, scratch_operands = 0 : i64, tpu.core_type = #tpu.core_type<tc>, window_params = [{pipeline_mode = #tpu.pipeline_mode<synchronous>, transform_indices = @transform_0, window_bounds = array<i64: 16, 8>}, {pipeline_mode = #tpu.pipeline_mode<synchronous>, transform_indices = @transform_1, window_bounds = array<i64: 16, 16>}, {pipeline_mode = #tpu.pipeline_mode<synchronous>, transform_indices = @transform_2, window_bounds = array<i64: 8, 192>}, {pipeline_mode = #tpu.pipeline_mode<synchronous>, transform_indices = @transform_3, window_bounds = array<i64: 192, 96>}, {pipeline_mode = #tpu.pipeline_mode<synchronous>, transform_indices = @transform_4, window_bounds = array<i64: 192, 6>}, {pipeline_mode = #tpu.pipeline_mode<synchronous>, transform_indices = @transform_5, window_bounds = array<i64: 96, 192>}, {pipeline_mode = #tpu.pipeline_mode<synchronous>, transform_indices = @transform_6, window_bounds = array<i64: 1, 192>}, {pipeline_mode = #tpu.pipeline_mode<synchronous>, transform_indices = @transform_7, window_bounds = array<i64: 192, 48>}, {pipeline_mode = #tpu.pipeline_mode<synchronous>, transform_indices = @transform_8, window_bounds = array<i64: 48, 96>}, {pipeline_mode = #tpu.pipeline_mode<synchronous>, transform_indices = @transform_9, window_bounds = array<i64: 48, 6>}, {pipeline_mode = #tpu.pipeline_mode<synchronous>, transform_indices = @transform_10, window_bounds = array<i64: 96, 48>}, {pipeline_mode = #tpu.pipeline_mode<synchronous>, transform_indices = @transform_11, window_bounds = array<i64: 1, 48>}, {pipeline_mode = #tpu.pipeline_mode<synchronous>, transform_indices = @transform_12, window_bounds = array<i64: 96, 96>}, {pipeline_mode = #tpu.pipeline_mode<synchronous>, transform_indices = @transform_13, window_bounds = array<i64: 48, 4>}, {pipeline_mode = #tpu.pipeline_mode<synchronous>, transform_indices = @transform_14, window_bounds = array<i64: 1, 4>}, {pipeline_mode = #tpu.pipeline_mode<synchronous>, transform_indices = @transform_15, window_bounds = array<i64: 16, 4>}, {pipeline_mode = #tpu.pipeline_mode<synchronous>, transform_indices = @transform_16, window_bounds = array<i64: 16, 48>}]} {
    %c0 = arith.constant 0 : index
    %c0_0 = arith.constant 0 : index
    %0 = vector.load %arg1[%c0, %c0_0] : memref<16x8xf32, #tpu.memory_space<vmem>>, vector<16x8xf32>
    %c0_1 = arith.constant 0 : index
    %c0_2 = arith.constant 0 : index
    %1 = vector.load %arg2[%c0_1, %c0_2] : memref<16x16xi8, #tpu.memory_space<vmem>>, vector<16x16xi8>
    %2 = arith.sitofp %1 : vector<16x16xi8> to vector<16x16xf32>
    %3 = tpu.concatenate %2, %2, %2, %2, %2, %2 in 1 : vector<16x16xf32>, vector<16x16xf32>, vector<16x16xf32>, vector<16x16xf32>, vector<16x16xf32>, vector<16x16xf32> -> vector<16x96xf32>
    %cst = arith.constant 0.000000e+00 : f32
    %4 = vector.broadcast %cst : f32 to vector<16x96xf32>
    %5 = arith.cmpf ogt, %3, %4 : vector<16x96xf32>
    %c0_3 = arith.constant 0 : index
    %c0_4 = arith.constant 0 : index
    %6 = vector.load %arg13[%c0_3, %c0_4] : memref<96x96xf32, #tpu.memory_space<vmem>>, vector<96x96xf32>
    %c0_5 = arith.constant 0 : index
    %c0_6 = arith.constant 0 : index
    %7 = vector.load %arg3[%c0_5, %c0_6] : memref<8x192xf32, #tpu.memory_space<vmem>>, vector<8x192xf32>
    %c0_7 = arith.constant 0 : index
    %c0_8 = arith.constant 0 : index
    %8 = vector.load %arg4[%c0_7, %c0_8] : memref<192x96xf32, #tpu.memory_space<vmem>>, vector<192x96xf32>
    %c0_9 = arith.constant 0 : index
    %c0_10 = arith.constant 0 : index
    %9 = vector.load %arg5[%c0_9, %c0_10] : memref<192x6xf32, #tpu.memory_space<vmem>>, vector<192x6xf32>
    %c0_11 = arith.constant 0 : index
    %c0_12 = arith.constant 0 : index
    %10 = vector.load %arg6[%c0_11, %c0_12] : memref<96x192xf32, #tpu.memory_space<vmem>>, vector<96x192xf32>
    %c0_13 = arith.constant 0 : index
    %c0_14 = arith.constant 0 : index
    %11 = vector.load %arg7[%c0_13, %c0_14] : memref<1x192xf32, #tpu.memory_space<vmem>>, vector<1x192xf32>
    %cst_15 = arith.constant dense<0.000000e+00> : vector<16x192xf32>
    %12 = tpu.matmul %0, %7, %cst_15 {dimension_numbers = #tpu.dot_dimension_numbers<[1], [0], [0], [1], [0, 0, 1, 1], [], []>} : vector<16x8xf32>, vector<8x192xf32>, vector<16x192xf32> -> vector<16x192xf32>
    %cst_16 = arith.constant dense<0.000000e+00> : vector<16x96xf32>
    %13 = tpu.matmul %12, %8, %cst_16 {dimension_numbers = #tpu.dot_dimension_numbers<[1], [0], [0], [1], [0, 0, 1, 1], [], []>} : vector<16x192xf32>, vector<192x96xf32>, vector<16x96xf32> -> vector<16x96xf32>
    %cst_17 = arith.constant dense<0.000000e+00> : vector<16x6xf32>
    %14 = tpu.matmul %12, %9, %cst_17 {dimension_numbers = #tpu.dot_dimension_numbers<[1], [0], [0], [1], [0, 0, 1, 1], [], []>} : vector<16x192xf32>, vector<192x6xf32>, vector<16x6xf32> -> vector<16x6xf32>
    %15 = tpu.transpose %14, [1, 0] : vector<16x6xf32> -> vector<6x16xf32>
    %16 = vector.extract_strided_slice %15 {offsets = [0, 0], sizes = [1, 16], strides = [1, 1]} : vector<6x16xf32> to vector<1x16xf32>
    %17 = vector.extract_strided_slice %15 {offsets = [1, 0], sizes = [1, 16], strides = [1, 1]} : vector<6x16xf32> to vector<1x16xf32>
    %18 = vector.extract_strided_slice %15 {offsets = [2, 0], sizes = [1, 16], strides = [1, 1]} : vector<6x16xf32> to vector<1x16xf32>
    %19 = vector.extract_strided_slice %15 {offsets = [3, 0], sizes = [1, 16], strides = [1, 1]} : vector<6x16xf32> to vector<1x16xf32>
    %20 = vector.extract_strided_slice %15 {offsets = [4, 0], sizes = [1, 16], strides = [1, 1]} : vector<6x16xf32> to vector<1x16xf32>
    %21 = vector.extract_strided_slice %15 {offsets = [5, 0], sizes = [1, 16], strides = [1, 1]} : vector<6x16xf32> to vector<1x16xf32>
    %22 = tpu.concatenate %16, %17, %18, %19, %20, %21 in 1 : vector<1x16xf32>, vector<1x16xf32>, vector<1x16xf32>, vector<1x16xf32>, vector<1x16xf32>, vector<1x16xf32> -> vector<1x96xf32>
    %23 = vector.broadcast %22 : vector<1x96xf32> to vector<16x96xf32>
    %24 = arith.addf %13, %23 : vector<16x96xf32>
    %cst_18 = arith.constant 0.000000e+00 : f32
    %25 = vector.broadcast %cst_18 : f32 to vector<16x96xf32>
    %26 = arith.cmpf ogt, %24, %25 : vector<16x96xf32>
    %cst_19 = arith.constant 2.000000e-01 : f32
    %27 = vector.broadcast %cst_19 : f32 to vector<16x96xf32>
    %28 = arith.mulf %27, %24 : vector<16x96xf32>
    %29 = arith.select %26, %24, %28 : vector<16x96xi1>, vector<16x96xf32>
    %cst_20 = arith.constant -1.000000e+30 : f32
    %30 = vector.broadcast %cst_20 : f32 to vector<16x96xf32>
    %31 = arith.select %5, %29, %30 : vector<16x96xi1>, vector<16x96xf32>
    %cst_21 = arith.constant dense<0xFF800000> : vector<16xf32>
    %32 = vector.multi_reduction <maximumf>, %31, %cst_21 [1] : vector<16x96xf32> to vector<16xf32>
    %33 = vector.shape_cast %32 : vector<16xf32> to vector<16x1xf32>
    %34 = vector.broadcast %33 : vector<16x1xf32> to vector<16x96xf32>
    %35 = arith.subf %31, %34 : vector<16x96xf32>
    %36 = math.exp %35 : vector<16x96xf32>
    %cst_22 = arith.constant dense<0.000000e+00> : vector<16x96xf32>
    %37 = tpu.matmul %36, %6, %cst_22 {dimension_numbers = #tpu.dot_dimension_numbers<[1], [0], [0], [1], [0, 0, 1, 1], [], []>} : vector<16x96xf32>, vector<96x96xf32>, vector<16x96xf32> -> vector<16x96xf32>
    %38 = tpu.reciprocal %37 {approx = true} : vector<16x96xf32> -> vector<16x96xf32>
    %39 = arith.mulf %36, %38 : vector<16x96xf32>
    %40 = tpu.concatenate %12, %12, %12, %12, %12, %12 in 0 : vector<16x192xf32>, vector<16x192xf32>, vector<16x192xf32>, vector<16x192xf32>, vector<16x192xf32>, vector<16x192xf32> -> vector<96x192xf32>
    %41 = arith.mulf %40, %10 : vector<96x192xf32>
    %cst_23 = arith.constant dense<0.000000e+00> : vector<16x192xf32>
    %42 = tpu.matmul %39, %41, %cst_23 {dimension_numbers = #tpu.dot_dimension_numbers<[1], [0], [0], [1], [0, 0, 1, 1], [], []>} : vector<16x96xf32>, vector<96x192xf32>, vector<16x192xf32> -> vector<16x192xf32>
    %43 = vector.broadcast %11 : vector<1x192xf32> to vector<16x192xf32>
    %44 = arith.addf %42, %43 : vector<16x192xf32>
    %cst_24 = arith.constant 0.000000e+00 : f32
    %45 = vector.broadcast %cst_24 : f32 to vector<16x192xf32>
    %46 = arith.cmpf ogt, %44, %45 : vector<16x192xf32>
    %cst_25 = arith.constant 0.000000e+00 : f32
    %47 = vector.broadcast %cst_25 : f32 to vector<16x192xf32>
    %48 = arith.minimumf %44, %47 : vector<16x192xf32>
    %49 = math.exp %48 : vector<16x192xf32>
    %cst_26 = arith.constant 1.000000e+00 : f32
    %50 = vector.broadcast %cst_26 : f32 to vector<16x192xf32>
    %51 = arith.subf %49, %50 : vector<16x192xf32>
    %52 = arith.select %46, %44, %51 : vector<16x192xi1>, vector<16x192xf32>
    %c0_27 = arith.constant 0 : index
    %c0_28 = arith.constant 0 : index
    %53 = vector.load %arg8[%c0_27, %c0_28] : memref<192x48xf32, #tpu.memory_space<vmem>>, vector<192x48xf32>
    %c0_29 = arith.constant 0 : index
    %c0_30 = arith.constant 0 : index
    %54 = vector.load %arg9[%c0_29, %c0_30] : memref<48x96xf32, #tpu.memory_space<vmem>>, vector<48x96xf32>
    %c0_31 = arith.constant 0 : index
    %c0_32 = arith.constant 0 : index
    %55 = vector.load %arg10[%c0_31, %c0_32] : memref<48x6xf32, #tpu.memory_space<vmem>>, vector<48x6xf32>
    %c0_33 = arith.constant 0 : index
    %c0_34 = arith.constant 0 : index
    %56 = vector.load %arg11[%c0_33, %c0_34] : memref<96x48xf32, #tpu.memory_space<vmem>>, vector<96x48xf32>
    %c0_35 = arith.constant 0 : index
    %c0_36 = arith.constant 0 : index
    %57 = vector.load %arg12[%c0_35, %c0_36] : memref<1x48xf32, #tpu.memory_space<vmem>>, vector<1x48xf32>
    %cst_37 = arith.constant dense<0.000000e+00> : vector<16x48xf32>
    %58 = tpu.matmul %52, %53, %cst_37 {dimension_numbers = #tpu.dot_dimension_numbers<[1], [0], [0], [1], [0, 0, 1, 1], [], []>} : vector<16x192xf32>, vector<192x48xf32>, vector<16x48xf32> -> vector<16x48xf32>
    %cst_38 = arith.constant dense<0.000000e+00> : vector<16x96xf32>
    %59 = tpu.matmul %58, %54, %cst_38 {dimension_numbers = #tpu.dot_dimension_numbers<[1], [0], [0], [1], [0, 0, 1, 1], [], []>} : vector<16x48xf32>, vector<48x96xf32>, vector<16x96xf32> -> vector<16x96xf32>
    %cst_39 = arith.constant dense<0.000000e+00> : vector<16x6xf32>
    %60 = tpu.matmul %58, %55, %cst_39 {dimension_numbers = #tpu.dot_dimension_numbers<[1], [0], [0], [1], [0, 0, 1, 1], [], []>} : vector<16x48xf32>, vector<48x6xf32>, vector<16x6xf32> -> vector<16x6xf32>
    %61 = tpu.transpose %60, [1, 0] : vector<16x6xf32> -> vector<6x16xf32>
    %62 = vector.extract_strided_slice %61 {offsets = [0, 0], sizes = [1, 16], strides = [1, 1]} : vector<6x16xf32> to vector<1x16xf32>
    %63 = vector.extract_strided_slice %61 {offsets = [1, 0], sizes = [1, 16], strides = [1, 1]} : vector<6x16xf32> to vector<1x16xf32>
    %64 = vector.extract_strided_slice %61 {offsets = [2, 0], sizes = [1, 16], strides = [1, 1]} : vector<6x16xf32> to vector<1x16xf32>
    %65 = vector.extract_strided_slice %61 {offsets = [3, 0], sizes = [1, 16], strides = [1, 1]} : vector<6x16xf32> to vector<1x16xf32>
    %66 = vector.extract_strided_slice %61 {offsets = [4, 0], sizes = [1, 16], strides = [1, 1]} : vector<6x16xf32> to vector<1x16xf32>
    %67 = vector.extract_strided_slice %61 {offsets = [5, 0], sizes = [1, 16], strides = [1, 1]} : vector<6x16xf32> to vector<1x16xf32>
    %68 = tpu.concatenate %62, %63, %64, %65, %66, %67 in 1 : vector<1x16xf32>, vector<1x16xf32>, vector<1x16xf32>, vector<1x16xf32>, vector<1x16xf32>, vector<1x16xf32> -> vector<1x96xf32>
    %69 = vector.broadcast %68 : vector<1x96xf32> to vector<16x96xf32>
    %70 = arith.addf %59, %69 : vector<16x96xf32>
    %cst_40 = arith.constant 0.000000e+00 : f32
    %71 = vector.broadcast %cst_40 : f32 to vector<16x96xf32>
    %72 = arith.cmpf ogt, %70, %71 : vector<16x96xf32>
    %cst_41 = arith.constant 2.000000e-01 : f32
    %73 = vector.broadcast %cst_41 : f32 to vector<16x96xf32>
    %74 = arith.mulf %73, %70 : vector<16x96xf32>
    %75 = arith.select %72, %70, %74 : vector<16x96xi1>, vector<16x96xf32>
    %cst_42 = arith.constant -1.000000e+30 : f32
    %76 = vector.broadcast %cst_42 : f32 to vector<16x96xf32>
    %77 = arith.select %5, %75, %76 : vector<16x96xi1>, vector<16x96xf32>
    %cst_43 = arith.constant dense<0xFF800000> : vector<16xf32>
    %78 = vector.multi_reduction <maximumf>, %77, %cst_43 [1] : vector<16x96xf32> to vector<16xf32>
    %79 = vector.shape_cast %78 : vector<16xf32> to vector<16x1xf32>
    %80 = vector.broadcast %79 : vector<16x1xf32> to vector<16x96xf32>
    %81 = arith.subf %77, %80 : vector<16x96xf32>
    %82 = math.exp %81 : vector<16x96xf32>
    %cst_44 = arith.constant dense<0.000000e+00> : vector<16x96xf32>
    %83 = tpu.matmul %82, %6, %cst_44 {dimension_numbers = #tpu.dot_dimension_numbers<[1], [0], [0], [1], [0, 0, 1, 1], [], []>} : vector<16x96xf32>, vector<96x96xf32>, vector<16x96xf32> -> vector<16x96xf32>
    %84 = tpu.reciprocal %83 {approx = true} : vector<16x96xf32> -> vector<16x96xf32>
    %85 = arith.mulf %82, %84 : vector<16x96xf32>
    %86 = tpu.concatenate %58, %58, %58, %58, %58, %58 in 0 : vector<16x48xf32>, vector<16x48xf32>, vector<16x48xf32>, vector<16x48xf32>, vector<16x48xf32>, vector<16x48xf32> -> vector<96x48xf32>
    %87 = arith.mulf %86, %56 : vector<96x48xf32>
    %cst_45 = arith.constant dense<0.000000e+00> : vector<16x48xf32>
    %88 = tpu.matmul %85, %87, %cst_45 {dimension_numbers = #tpu.dot_dimension_numbers<[1], [0], [0], [1], [0, 0, 1, 1], [], []>} : vector<16x96xf32>, vector<96x48xf32>, vector<16x48xf32> -> vector<16x48xf32>
    %89 = vector.broadcast %57 : vector<1x48xf32> to vector<16x48xf32>
    %90 = arith.addf %88, %89 : vector<16x48xf32>
    %c0_46 = arith.constant 0 : index
    %c0_47 = arith.constant 0 : index
    %91 = vector.load %arg17[%c0_46, %c0_47] : memref<16x48xf32, #tpu.memory_space<vmem>>, vector<16x48xf32>
    tpu.vector_store %arg17[%c0_46, %c0_47], %90 {strides = array<i32>} : memref<16x48xf32, #tpu.memory_space<vmem>>, vector<16x48xf32>,
    %c0_48 = arith.constant 0 : index
    %c0_49 = arith.constant 0 : index
    %92 = vector.load %arg14[%c0_48, %c0_49] : memref<48x4xf32, #tpu.memory_space<vmem>>, vector<48x4xf32>
    %cst_50 = arith.constant dense<0.000000e+00> : vector<16x4xf32>
    %93 = tpu.matmul %90, %92, %cst_50 {dimension_numbers = #tpu.dot_dimension_numbers<[1], [0], [0], [1], [0, 0, 1, 1], [], []>} : vector<16x48xf32>, vector<48x4xf32>, vector<16x4xf32> -> vector<16x4xf32>
    %c0_51 = arith.constant 0 : index
    %c0_52 = arith.constant 0 : index
    %94 = vector.load %arg15[%c0_51, %c0_52] : memref<1x4xf32, #tpu.memory_space<vmem>>, vector<1x4xf32>
    %95 = vector.broadcast %94 : vector<1x4xf32> to vector<16x4xf32>
    %96 = arith.addf %93, %95 : vector<16x4xf32>
    %c0_53 = arith.constant 0 : index
    %c0_54 = arith.constant 0 : index
    %97 = vector.load %arg16[%c0_53, %c0_54] : memref<16x4xf32, #tpu.memory_space<vmem>>, vector<16x4xf32>
    tpu.vector_store %arg16[%c0_53, %c0_54], %96 {strides = array<i32>} : memref<16x4xf32, #tpu.memory_space<vmem>>, vector<16x4xf32>,
    return
  }
  func.func @transform_0(%arg0: i32) -> (i32, i32) {
    %c0_i32 = arith.constant 0 : i32
    %c0_i32_0 = arith.constant 0 : i32
    %c0_i32_1 = arith.constant 0 : i32
    return %c0_i32, %c0_i32_0 : i32, i32
  }
  func.func @transform_1(%arg0: i32) -> (i32, i32) {
    %c0_i32 = arith.constant 0 : i32
    %c0_i32_0 = arith.constant 0 : i32
    %c0_i32_1 = arith.constant 0 : i32
    return %c0_i32, %c0_i32_0 : i32, i32
  }
  func.func @transform_2(%arg0: i32) -> (i32, i32) {
    %c0_i32 = arith.constant 0 : i32
    %c0_i32_0 = arith.constant 0 : i32
    %c0_i32_1 = arith.constant 0 : i32
    return %c0_i32, %c0_i32_0 : i32, i32
  }
  func.func @transform_3(%arg0: i32) -> (i32, i32) {
    %c0_i32 = arith.constant 0 : i32
    %c0_i32_0 = arith.constant 0 : i32
    %c0_i32_1 = arith.constant 0 : i32
    return %c0_i32, %c0_i32_0 : i32, i32
  }
  func.func @transform_4(%arg0: i32) -> (i32, i32) {
    %c0_i32 = arith.constant 0 : i32
    %c0_i32_0 = arith.constant 0 : i32
    %c0_i32_1 = arith.constant 0 : i32
    return %c0_i32, %c0_i32_0 : i32, i32
  }
  func.func @transform_5(%arg0: i32) -> (i32, i32) {
    %c0_i32 = arith.constant 0 : i32
    %c0_i32_0 = arith.constant 0 : i32
    %c0_i32_1 = arith.constant 0 : i32
    return %c0_i32, %c0_i32_0 : i32, i32
  }
  func.func @transform_6(%arg0: i32) -> (i32, i32) {
    %c0_i32 = arith.constant 0 : i32
    %c0_i32_0 = arith.constant 0 : i32
    %c0_i32_1 = arith.constant 0 : i32
    return %c0_i32, %c0_i32_0 : i32, i32
  }
  func.func @transform_7(%arg0: i32) -> (i32, i32) {
    %c0_i32 = arith.constant 0 : i32
    %c0_i32_0 = arith.constant 0 : i32
    %c0_i32_1 = arith.constant 0 : i32
    return %c0_i32, %c0_i32_0 : i32, i32
  }
  func.func @transform_8(%arg0: i32) -> (i32, i32) {
    %c0_i32 = arith.constant 0 : i32
    %c0_i32_0 = arith.constant 0 : i32
    %c0_i32_1 = arith.constant 0 : i32
    return %c0_i32, %c0_i32_0 : i32, i32
  }
  func.func @transform_9(%arg0: i32) -> (i32, i32) {
    %c0_i32 = arith.constant 0 : i32
    %c0_i32_0 = arith.constant 0 : i32
    %c0_i32_1 = arith.constant 0 : i32
    return %c0_i32, %c0_i32_0 : i32, i32
  }
  func.func @transform_10(%arg0: i32) -> (i32, i32) {
    %c0_i32 = arith.constant 0 : i32
    %c0_i32_0 = arith.constant 0 : i32
    %c0_i32_1 = arith.constant 0 : i32
    return %c0_i32, %c0_i32_0 : i32, i32
  }
  func.func @transform_11(%arg0: i32) -> (i32, i32) {
    %c0_i32 = arith.constant 0 : i32
    %c0_i32_0 = arith.constant 0 : i32
    %c0_i32_1 = arith.constant 0 : i32
    return %c0_i32, %c0_i32_0 : i32, i32
  }
  func.func @transform_12(%arg0: i32) -> (i32, i32) {
    %c0_i32 = arith.constant 0 : i32
    %c0_i32_0 = arith.constant 0 : i32
    %c0_i32_1 = arith.constant 0 : i32
    return %c0_i32, %c0_i32_0 : i32, i32
  }
  func.func @transform_13(%arg0: i32) -> (i32, i32) {
    %c0_i32 = arith.constant 0 : i32
    %c0_i32_0 = arith.constant 0 : i32
    %c0_i32_1 = arith.constant 0 : i32
    return %c0_i32, %c0_i32_0 : i32, i32
  }
  func.func @transform_14(%arg0: i32) -> (i32, i32) {
    %c0_i32 = arith.constant 0 : i32
    %c0_i32_0 = arith.constant 0 : i32
    %c0_i32_1 = arith.constant 0 : i32
    return %c0_i32, %c0_i32_0 : i32, i32
  }
  func.func @transform_15(%arg0: i32) -> (i32, i32) {
    %c0_i32 = arith.constant 0 : i32
    %c0_i32_0 = arith.constant 0 : i32
    %c0_i32_1 = arith.constant 0 : i32
    return %c0_i32, %c0_i32_0 : i32, i32
  }
  func.func @transform_16(%arg0: i32) -> (i32, i32) {
    %c0_i32 = arith.constant 0 : i32
    %c0_i32_0 = arith.constant 0 : i32
    %c0_i32_1 = arith.constant 0 : i32
    return %c0_i32, %c0_i32_0 : i32, i32
  }
}

</mosaic_0001>

<bundles_post_ra>
// kernel: tpu_custom_call.1
= control target key start
LH: loop header
LB: loop body
LE: loop exit
PB: predicated region body
PF: predicated region fallthrough
CT: control target
= control target key end

     0   :  { %s2664_s0 = inlined_call_operand.vmem [shape: f32[16,8], index: 0, kind: input, shape index: {}]   ;;  %s2665_s1 = inlined_call_operand.vmem [shape: s8[16,16], index: 1, kind: input, shape index: {}]   ;;  %s2666_s2 = inlined_call_operand.vmem [shape: f32[8,192], index: 2, kind: input, shape index: {}]   ;;  %s2667_s3 = inlined_call_operand.vmem [shape: f32[192,96], index: 3, kind: input, shape index: {}]   ;;  %s2668_s4 = inlined_call_operand.vmem [shape: f32[192,6], index: 4, kind: input, shape index: {}]   ;;  %s2669_s5 = inlined_call_operand.vmem [shape: f32[96,192], index: 5, kind: input, shape index: {}]   ;;  %s2670_s6 = inlined_call_operand.vmem [shape: f32[1,192], index: 6, kind: input, shape index: {}]   ;;  %s2671_s7 = inlined_call_operand.vmem [shape: f32[192,48], index: 7, kind: input, shape index: {}]   ;;  %s2672_s8 = inlined_call_operand.vmem [shape: f32[48,96], index: 8, kind: input, shape index: {}]   ;;  %s2673_s9 = inlined_call_operand.vmem [shape: f32[48,6], index: 9, kind: input, shape index: {}]   ;;  %s2674_s10 = inlined_call_operand.vmem [shape: f32[96,48], index: 10, kind: input, shape index: {}]   ;;  %s2675_s11 = inlined_call_operand.vmem [shape: f32[1,48], index: 11, kind: input, shape index: {}]   ;;  %s2676_s12 = inlined_call_operand.vmem [shape: f32[96,96], index: 12, kind: input, shape index: {}]   ;;  %s2677_s13 = inlined_call_operand.vmem [shape: f32[48,4], index: 13, kind: input, shape index: {}]   ;;  %s2678_s14 = inlined_call_operand.vmem [shape: f32[1,4], index: 14, kind: input, shape index: {}]   ;;  %s2679_s15 = inlined_call_operand.vmem [shape: f32[16,4], index: 15, kind: output, shape index: {0}]   ;;  %s2680_s16 = inlined_call_operand.hbm [shape: f32[16,48], index: 16, kind: output, shape index: {1}]  }
   0x1   :  { %2682 = sst [smem:[#allocation5_spill]] %s2664_s0 }
   0x2   :  { %v123_v0 = vld [vmem:[%s2666_s2 + $0x8] sm:$0xff]  ;;  %v122_v1 = vld [vmem:[%s2666_s2] sm:$0xff]  ;;  %s2683_s27 = sld [smem:[#allocation5_spill]]  ;;  %vm197_vm0 = vcmask 64512   ;;  %v1940_v3 = vmov 0.0   ;;  %v1941_v6 = vmov 0.0|0.0  }
   0x3   :  { %204 = vmatprep.subr.mxu0 %v123_v0  ;;  %268 = vmatprep.mubr.f32.mxu0 %v1940_v3  ;;  %v148_v4 = vld [vmem:[%s2668_s4] sm:$0xff]  ;;  %v149_v5 = vld [vmem:[%s2668_s4 + $0x8] sm:$0xff]  ;;  %v150_v10 = vld [vmem:[%s2668_s4 + $0x10] sm:$0xff] }
   0x4   :  { %205 = vmatpush1.msra.mxu0 %v122_v1  ;;  %1642 = vmatprep.subr.bf16.mxu1 %v1941_v6  ;;  %v1643_v7 = vpack.c.bf16 %v149_v5, %v148_v4  ;;  %v124_v8 = vld [vmem:[%s2667_s3] sm:$0xff]  ;;  %v125_v9 = vld [vmem:[%s2667_s3 + $0x8] sm:$0xff]  ;;  %v151_v12 = vld [vmem:[%s2668_s4 + $0x18] sm:$0xff] }
   0x5   :  { %1678 = vmatprep.subr.bf16.mxu0 %v1941_v6  ;;  %v1679_v11 = vpack.c.bf16 %v125_v9, %v124_v8  ;;  %v126_v13 = vld [vmem:[%s2667_s3 + $0x10] sm:$0xff]  ;;  %v127_v14 = vld [vmem:[%s2667_s3 + $0x18] sm:$0xff]  ;;  %v1646_v16 = vpack.c.bf16 %v151_v12, %v150_v10  ;;  %v152_v18 = vld [vmem:[%s2668_s4 + $0x20] sm:$0xff] }
   0x6   :  { %1644 = vmatpush1.bf16.msra.mxu1 %v1643_v7  ;;  %v1682_v17 = vpack.c.bf16 %v127_v14, %v126_v13  ;;  %v153_v19 = vld [vmem:[%s2668_s4 + $0x28] sm:$0xff]  ;;  %v128_v20 = vld [vmem:[%s2667_s3 + $0x20] sm:$0xff]  ;;  %v154_v24 = vld [vmem:[%s2668_s4 + $0x30] sm:$0xff] }
   0x7   :  { %1645 = vmatprep.subr.bf16.mxu1 %v1941_v6  ;;  %v129_v21 = vld [vmem:[%s2667_s3 + $0x28] sm:$0xff]  ;;  %v1649_v22 = vpack.c.bf16 %v153_v19, %v152_v18  ;;  %v155_v25 = vld [vmem:[%s2668_s4 + $0x38] sm:$0xff]  ;;  %v130_v26 = vld [vmem:[%s2667_s3 + $0x30] sm:$0xff] }
   0x8   :  { %v53_v2 = vld [vmem:[%s2683_s27] sm:$0xff]  ;;  %v54_v15 = vld [vmem:[%s2683_s27 + $0x8] sm:$0xff]  ;;  %v1685_v23 = vpack.c.bf16 %v129_v21, %v128_v20  ;;  %v131_v27 = vld [vmem:[%s2667_s3 + $0x38] sm:$0xff]  ;;  %v1652_v28 = vpack.c.bf16 %v155_v25, %v154_v24 }
   0x9   :  { %1418 = vmatmul.mubr.msk.f32.vlgmr.msra.gmra.mrb[0].mxu0 %vm197_vm0, %v53_v2  ;;  %v1688_v29 = vpack.c.bf16 %v131_v27, %v130_v26  ;;  %v156_v30 = vld [vmem:[%s2668_s4 + $0x40] sm:$0xff]  ;;  %v157_v31 = vld [vmem:[%s2668_s4 + $0x48] sm:$0xff] }
   0xa   :  { %274 = vmatprep.mubr.f32.mxu0 %v1940_v3  ;;  %1680 = vmatpush1.bf16.msra.mxu0 %v1679_v11  ;;  %v132_v32 = vld [vmem:[%s2667_s3 + $0x40] sm:$0xff]  ;;  %v133_v33 = vld [vmem:[%s2667_s3 + $0x48] sm:$0xff]  ;;  %v1655_v34 = vpack.c.bf16 %v157_v31, %v156_v30 }
   0xb   :  { %1681 = vmatprep.subr.bf16.mxu0 %v1941_v6  ;;  %1647 = vmatpush1.bf16.msra.mxu1 %v1646_v16 }
   0xc   :  { %1648 = vmatprep.subr.bf16.mxu1 %v1941_v6 }
   0xd   :  { %1419 = vmatmul.mubr.msk.f32.gmra.mrb[2].mxu0 %vm197_vm0, %v54_v15 }
   0xe   :  { %1683 = vmatpush1.bf16.msra.mxu0 %v1682_v17 }
   0xf   :  { %1684 = vmatprep.subr.bf16.mxu0 %v1941_v6  ;;  %1650 = vmatpush1.bf16.msra.mxu1 %v1649_v22 }
  0x10   :  { %1651 = vmatprep.subr.bf16.mxu1 %v1941_v6 }
  0x12   :  { %1686 = vmatpush1.bf16.msra.mxu0 %v1685_v23 }
  0x13   :  { %1687 = vmatprep.subr.bf16.mxu0 %v1941_v6  ;;  %1653 = vmatpush1.bf16.msra.mxu1 %v1652_v28 }
  0x14   :  { %22 = vsyncpa [#allocation3], 0  ;;  %1654 = vmatprep.subr.bf16.mxu1 %v1941_v6  ;;  %v1691_v35 = vpack.c.bf16 %v133_v33, %v132_v32  ;;  %v158_v36 = vld [vmem:[%s2668_s4 + $0x50] sm:$0xff]  ;;  %v159_v37 = vld [vmem:[%s2668_s4 + $0x58] sm:$0xff]  ;;  %vm102_vm1 = vcmask 523264   ;;  %s1942_s25 = smov 48  }
  0x15   :  { %v134_v38 = vld [vmem:[%s2667_s3 + $0x50] sm:$0xff]  ;;  %v135_v39 = vld [vmem:[%s2667_s3 + $0x58] sm:$0xff]  ;;  %v1658_v40 = vpack.c.bf16 %v159_v37, %v158_v36  ;;  %v160_v42 = vld [vmem:[%s2668_s4 + $0x60] sm:$0xff]  ;;  %s1943_s26 = smov 16   ;;  %s1944_s28 = smov 32   ;;  %vm93_vm2 = vcmask 130048  }
  0x16   :  { %1689 = vmatpush1.bf16.msra.mxu0 %v1688_v29  ;;  %v1694_v41 = vpack.c.bf16 %v135_v39, %v134_v38  ;;  %v161_v43 = vld [vmem:[%s2668_s4 + $0x68] sm:$0xff]  ;;  %v136_v44 = vld [vmem:[%s2667_s3 + $0x60] sm:$0xff]  ;;  %v162_v48 = vld [vmem:[%s2668_s4 + $0x70] sm:$0xff]  ;;  %s1945_s29 = smov 80   ;;  %vm96_vm3 = vcmask 261120   ;;  %vm99_vm4 = vcmask 392192  }
  0x17   :  { %1690 = vmatprep.subr.bf16.mxu0 %v1941_v6  ;;  %1656 = vmatpush1.bf16.msra.mxu1 %v1655_v34  ;;  %v137_v45 = vld [vmem:[%s2667_s3 + $0x68] sm:$0xff]  ;;  %v1661_v46 = vpack.c.bf16 %v161_v43, %v160_v42  ;;  %v163_v49 = vld [vmem:[%s2668_s4 + $0x78] sm:$0xff]  ;;  %v138_v50 = vld [vmem:[%s2667_s3 + $0x70] sm:$0xff]  ;;  %vm105_vm5 = vcmask 654336   ;;  %vm507_vm6 = vcmask 785408  }
  0x18   :  { %1657 = vmatprep.subr.bf16.mxu1 %v1941_v6  ;;  %v1697_v47 = vpack.c.bf16 %v137_v45, %v136_v44  ;;  %v139_v51 = vld [vmem:[%s2667_s3 + $0x78] sm:$0xff]  ;;  %v1664_v52 = vpack.c.bf16 %v163_v49, %v162_v48  ;;  %v164_v54 = vld [vmem:[%s2668_s4 + $0x80] sm:$0xff]  ;;  %v165_v55 = vld [vmem:[%s2668_s4 + $0x88] sm:$0xff] }
  0x19   :  { %v1700_v53 = vpack.c.bf16 %v139_v51, %v138_v50  ;;  %v140_v56 = vld [vmem:[%s2667_s3 + $0x80] sm:$0xff]  ;;  %v141_v57 = vld [vmem:[%s2667_s3 + $0x88] sm:$0xff]  ;;  %v1667_v58 = vpack.c.bf16 %v165_v55, %v164_v54  ;;  %v166_v60 = vld [vmem:[%s2668_s4 + $0x90] sm:$0xff] }
  0x1a   :  { %1692 = vmatpush1.bf16.msra.mxu0 %v1691_v35  ;;  %v1703_v59 = vpack.c.bf16 %v141_v57, %v140_v56  ;;  %v167_v61 = vld [vmem:[%s2668_s4 + $0x98] sm:$0xff]  ;;  %v142_v62 = vld [vmem:[%s2667_s3 + $0x90] sm:$0xff]  ;;  %v168_v2 = vld [vmem:[%s2668_s4 + $0xa0] sm:$0xff] }
  0x1b   :  { %1693 = vmatprep.subr.bf16.mxu0 %v1941_v6  ;;  %1659 = vmatpush1.bf16.msra.mxu1 %v1658_v40  ;;  %v143_v63 = vld [vmem:[%s2667_s3 + $0x98] sm:$0xff]  ;;  %v1670_v0 = vpack.c.bf16 %v167_v61, %v166_v60  ;;  %v169_v4 = vld [vmem:[%s2668_s4 + $0xa8] sm:$0xff]  ;;  %v144_v5 = vld [vmem:[%s2667_s3 + $0xa0] sm:$0xff] }
  0x1c   :  { %1660 = vmatprep.subr.bf16.mxu1 %v1941_v6  ;;  %v1706_v1 = vpack.c.bf16 %v143_v63, %v142_v62  ;;  %v145_v7 = vld [vmem:[%s2667_s3 + $0xa8] sm:$0xff]  ;;  %v1673_v8 = vpack.c.bf16 %v169_v4, %v168_v2  ;;  %v170_v10 = vld [vmem:[%s2668_s4 + $0xb0] sm:$0xff]  ;;  %v171_v11 = vld [vmem:[%s2668_s4 + $0xb8] sm:$0xff] }
  0x1d   :  { %v1709_v9 = vpack.c.bf16 %v145_v7, %v144_v5  ;;  %v146_v12 = vld [vmem:[%s2667_s3 + $0xb0] sm:$0xff]  ;;  %v1676_v13 = vpack.c.bf16 %v171_v11, %v170_v10  ;;  %v147_v14 = vld [vmem:[%s2667_s3 + $0xb8] sm:$0xff]  ;;  %v172_v16 = vld [vmem:[%s2669_s5] sm:$0xff] }
  0x1e   :  { %1695 = vmatpush1.bf16.msra.mxu0 %v1694_v41  ;;  %v1712_v15 = vpack.c.bf16 %v147_v14, %v146_v12  ;;  %v176_v17 = vld [vmem:[%s2669_s5 + $0x20] sm:$0xff]  ;;  %v173_v19 = vld [vmem:[%s2669_s5 + $0x8] sm:$0xff]  ;;  %v174_v27 = vld [vmem:[%s2669_s5 + $0x10] sm:$0xff] }
  0x1f   :  { %1696 = vmatprep.subr.bf16.mxu0 %v1941_v6  ;;  %1662 = vmatpush1.bf16.msra.mxu1 %v1661_v46  ;;  %v180_v18 = vld [vmem:[%s2669_s5 + $0x40] sm:$0xff]  ;;  %v177_v20 = vld [vmem:[%s2669_s5 + $0x28] sm:$0xff]  ;;  %v178_v31 = vld [vmem:[%s2669_s5 + $0x30] sm:$0xff] }
  0x20   :  { %1663 = vmatprep.subr.bf16.mxu1 %v1941_v6  ;;  %v184_v21 = vld [vmem:[%s2669_s5 + $0x60] sm:$0xff]  ;;  %v181_v23 = vld [vmem:[%s2669_s5 + $0x48] sm:$0xff]  ;;  %v182_v33 = vld [vmem:[%s2669_s5 + $0x50] sm:$0xff] }
  0x21   :  { %v185_v24 = vld [vmem:[%s2669_s5 + $0x68] sm:$0xff]  ;;  %v188_v29 = vld [vmem:[%s2669_s5 + $0x80] sm:$0xff]  ;;  %v186_v35 = vld [vmem:[%s2669_s5 + $0x70] sm:$0xff] }
  0x22   :  { %1698 = vmatpush1.bf16.msra.mxu0 %v1697_v47  ;;  %v189_v25 = vld [vmem:[%s2669_s5 + $0x88] sm:$0xff]  ;;  %v175_v37 = vld [vmem:[%s2669_s5 + $0x18] sm:$0xff]  ;;  %v192_v63 = vld [vmem:[%s2669_s5 + $0xa0] sm:$0xff] }
  0x23   :  { %1699 = vmatprep.subr.bf16.mxu0 %v1941_v6  ;;  %1665 = vmatpush1.bf16.msra.mxu1 %v1664_v52  ;;  %v193_v30 = vld [vmem:[%s2669_s5 + $0xa8] sm:$0xff]  ;;  %v179_v39 = vld [vmem:[%s2669_s5 + $0x38] sm:$0xff] }
  0x24   :  { %1666 = vmatprep.subr.bf16.mxu1 %v1941_v6  ;;  %v183_v41 = vld [vmem:[%s2669_s5 + $0x58] sm:$0xff] }
  0x25   :  { %v187_v52 = vld [vmem:[%s2669_s5 + $0x78] sm:$0xff] }
  0x26   :  { %1701 = vmatpush1.bf16.msra.mxu0 %v1700_v53  ;;  %v191_v57 = vld [vmem:[%s2669_s5 + $0x98] sm:$0xff] }
  0x27   :  { %1702 = vmatprep.subr.bf16.mxu0 %v1941_v6  ;;  %1668 = vmatpush1.bf16.msra.mxu1 %v1667_v58  ;;  %v190_v58 = vld [vmem:[%s2669_s5 + $0x90] sm:$0xff] }
  0x28   :  { %1669 = vmatprep.subr.bf16.mxu1 %v1941_v6 }
  0x2a   :  { %1704 = vmatpush1.bf16.msra.mxu0 %v1703_v59  ;;  %v195_v59 = vld [vmem:[%s2669_s5 + $0xb8] sm:$0xff] }
  0x2b   :  { %1705 = vmatprep.subr.bf16.mxu0 %v1941_v6  ;;  %1671 = vmatpush1.bf16.msra.mxu1 %v1670_v0  ;;  %v194_v0 = vld [vmem:[%s2669_s5 + $0xb0] sm:$0xff] }
  0x2c   :  { %1672 = vmatprep.subr.bf16.mxu1 %v1941_v6 }
  0x2e   :  { %1707 = vmatpush1.bf16.msra.mxu0 %v1706_v1 }
  0x2f   :  { %1708 = vmatprep.subr.bf16.mxu0 %v1941_v6  ;;  %1674 = vmatpush1.bf16.msra.mxu1 %v1673_v8 }
  0x30   :  { %1675 = vmatprep.subr.bf16.mxu1 %v1941_v6 }
  0x32   :  { %1710 = vmatpush1.bf16.msra.mxu0 %v1709_v9 }
  0x33   :  { %1711 = vmatprep.subr.bf16.mxu0 %v1941_v6  ;;  %1677 = vmatpush1.bf16.msra.mxu1 %v1676_v13 }
  0x36   :  { %1713 = vmatpush1.bf16.msra.mxu0 %v1712_v15 }
  0xdc   :  { %v270_v22 = vpop.f32.mrb[0].mxu0 }
  0xdd   :  { %v272_v26 = vpop.f32.mrb[1].mxu0  ;;  %v605_v28 = vmul.f32 %v270_v22, %v172_v16  ;;  %v609_v32 = vmul.f32 %v270_v22, %v176_v17  ;;  %v613_v34 = vmul.f32 %v270_v22, %v180_v18  ;;  %v617_v36 = vmul.f32 %v270_v22, %v184_v21 }
  0xde   :  { %1420 = vmatprep.mubr.msk.f32.mxu1 %vm102_vm1, %v272_v26  ;;  %1422 = vmatprep.mubr.msk.f32.mxu0 %vm102_vm1, %v272_v26  ;;  %v606_v38 = vmul.f32 %v272_v26, %v173_v19  ;;  %v610_v40 = vmul.f32 %v272_v26, %v177_v20  ;;  %v614_v42 = vmul.f32 %v272_v26, %v181_v23 }
  0xdf   :  { %352 = vmatmul.mubr.f32.vlgmr.msra.gmra.mrb[0].mxu1 %v270_v22  ;;  %489 = vmatmul.mubr.f32.vlgmr.msra.gmra.mrb[4].mxu0 %v270_v22  ;;  %v618_v44 = vmul.f32 %v272_v26, %v185_v24  ;;  %v622_v45 = vmul.f32 %v272_v26, %v189_v25  ;;  %v621_v46 = vmul.f32 %v270_v22, %v188_v29 }
  0xe0   :  { %v276_v43 = vpop.f32.mrb[2].mxu0  ;;  %v626_v47 = vmul.f32 %v272_v26, %v193_v30  ;;  %v625_v12 = vmul.f32 %v270_v22, %v192_v63 }
  0xe1   :  { %v278_v48 = vpop.f32.mrb[3].mxu0  ;;  %v607_v49 = vmul.f32 %v276_v43, %v174_v27  ;;  %v611_v50 = vmul.f32 %v276_v43, %v178_v31  ;;  %v615_v51 = vmul.f32 %v276_v43, %v182_v33  ;;  %v619_v53 = vmul.f32 %v276_v43, %v186_v35  ;;  %v1447_v27 = vld [vmem:[%s2665_s1] sm:$0xf]   ;;  %s1946_s1 = smov 64  }
  0xe2   :  { %1421 = vmatprep.mubr.msk.f32.mxu1 %vm102_vm1, %v278_v48  ;;  %1423 = vmatprep.mubr.msk.f32.mxu0 %vm102_vm1, %v278_v48  ;;  %v608_v54 = vmul.f32 %v278_v48, %v175_v37  ;;  %v612_v55 = vmul.f32 %v278_v48, %v179_v39  ;;  %v616_v56 = vmul.f32 %v278_v48, %v183_v41  ;;  %v1449_v30 = vunpack.c.1.s8 %v1447_v27  ;;  %v110_v37 = vld [vmem:[%s2676_s12] sm:$0xff]  ;;  %v112_v39 = vld [vmem:[%s2676_s12 + $0x10] sm:$0xff]  ;;  %v113_v41 = vld [vmem:[%s2676_s12 + $0x18] sm:$0xff] }
  0xe3   :  { %357 = vmatmul.mubr.f32.gmra.mrb[2].mxu1 %v276_v43  ;;  %494 = vmatmul.mubr.f32.gmra.mrb[6].mxu0 %v276_v43  ;;  %v1740_v60 = vpack.c.bf16 %v607_v49, %v605_v28  ;;  %v1744_v61 = vpack.c.bf16 %v611_v50, %v609_v32  ;;  %v1748_v62 = vpack.c.bf16 %v615_v51, %v613_v34  ;;  %v1448_v31 = vunpack.c.0.s8 %v1447_v27 }
  0xe4   :  { %v1738_v1 = vpack.c.bf16 %v608_v54, %v606_v38  ;;  %v1742_v2 = vpack.c.bf16 %v612_v55, %v610_v40  ;;  %v1746_v4 = vpack.c.bf16 %v616_v56, %v614_v42  ;;  %v620_v5 = vmul.f32 %v278_v48, %v187_v52  ;;  %710 = vmatprep.mubr.f32.mxu0 %v1940_v3  ;;  %v111_v38 = vld [vmem:[%s2676_s12 + $0x8] sm:$0xff] }
  0xe5   :  { %v1752_v7 = vpack.c.bf16 %v619_v53, %v617_v36  ;;  %v624_v8 = vmul.f32 %v278_v48, %v191_v57  ;;  %v623_v9 = vmul.f32 %v276_v43, %v190_v58  ;;  %v628_v10 = vmul.f32 %v278_v48, %v195_v59 }
  0xe6   :  { %1739 = vmatprep.subr.bf16.mxu0 %v1738_v1  ;;  %v1750_v11 = vpack.c.bf16 %v620_v5, %v618_v44  ;;  %v627_v13 = vmul.f32 %v276_v43, %v194_v0  ;;  %v60_v33 = vcvt.s32.f32 %v1449_v30  ;;  %v59_v34 = vcvt.s32.f32 %v1448_v31  ;;  %v118_v30 = vld [vmem:[%s2676_s12 + $0x40] sm:$0xff] }
  0xe7   :  { %1741 = vmatpush1.bf16.msra.mxu0 %v1740_v60  ;;  %v1754_v14 = vpack.c.bf16 %v624_v8, %v622_v45  ;;  %v1756_v15 = vpack.c.bf16 %v623_v9, %v621_v46  ;;  %v1758_v16 = vpack.c.bf16 %v628_v10, %v626_v47  ;;  %v2325_v40 = vpack.c.bf16 %v111_v38, %v110_v37 }
  0xe8   :  { %1743 = vmatprep.subr.bf16.mxu0 %v1742_v2  ;;  %v1760_v17 = vpack.c.bf16 %v627_v13, %v625_v12  ;;  %v2330_v42 = vpack.c.bf16 %v113_v41, %v112_v39  ;;  %v420_v51 = vlaneseq }
  0xe9   :  { %1715 = vmatprep.subr.bf16.mxu1 %v2325_v40 }
  0xea   :  { %1717 = vmatpush3.bf16.msra.mxu1 %v2325_v40  ;;  %v2338_v53 = vshrl.u32 %v420_v51, 7  ;;  %v750_v51 = vld [vmem:[%s2671_s7 + $0x18] sm:$0xff] }
  0xeb   :  { %1745 = vmatpush1.bf16.msra.mxu0 %v1744_v61  ;;  %1719 = vmatprep.subr.bf16.mxu1 %v2330_v42 }
  0xec   :  { %1747 = vmatprep.subr.bf16.mxu0 %v1746_v4  ;;  %v2343_v58 = vsub.s32 0, %v2338_v53 }
  0xee   :  { %1721 = vmatpush3.bf16.msra.mxu1 %v2330_v42 }
  0xef   :  { %1749 = vmatpush1.bf16.msra.mxu0 %v1748_v62 }
  0xf0   :  { %1751 = vmatprep.subr.bf16.mxu0 %v1750_v11 }
  0xf3   :  { %1753 = vmatpush1.bf16.msra.mxu0 %v1752_v7 }
  0xf4   :  { %1755 = vmatprep.subr.bf16.mxu0 %v1754_v14 }
  0xf7   :  { %1757 = vmatpush1.bf16.msra.mxu0 %v1756_v15 }
  0xf8   :  { %1759 = vmatprep.subr.bf16.mxu0 %v1758_v16 }
  0xfb   :  { %1761 = vmatpush1.bf16.msra.mxu0 %v1760_v17 }
 0x1b2   :  { %v353_v18 = vpop.f32.mrb[0].mxu1  ;;  %v2296_v19 = vpop.f32.mrb[4].mxu0 }
 0x1b3   :  { %362 = vxpose.xlu0.b32.start [1/2] (short) (narrow) %v353_v18, 8  ;;  %v355_v20 = vpop.f32.mrb[1].mxu1  ;;  %v492_v21 = vpop.f32.mrb[5].mxu0 }
 0x1b6   :  { %v358_v22 = vpop.f32.mrb[2].mxu1  ;;  %v2298_v23 = vpop.f32.mrb[6].mxu0 }
 0x1b7   :  { %v497_v24 = vpop.f32.mrb[7].mxu0  ;;  %363 = vxpose.xlu0.b32.end [2/2] (short) (narrow) %v358_v22, 8  ;;  %v360_v25 = vpop.f32.mrb[3].mxu1 }
 0x1b8   :  { %v114_v25 = vld [vmem:[%s2676_s12 + $0x20] sm:$0xff] }
 0x233   :  { %v378_v26 = vpop.trf.xlu0 }
 0x234   :  { %v403_v28 = vrot.slane %v378_v26, 3  ;;  %v395_v29 = vrot.slane %v378_v26, 1  ;;  %v399_v32 = vrot.slane %v378_v26, 2  ;;  %v407_v35 = vrot.slane %v378_v26, 4 }
 0x235   :  { %v411_v36 = vrot.slane %v378_v26, 5 }
 0x236   :  { %404 = vrot.lane.b32.xlu0 %v403_v28, %s1942_s25  ;;  %396 = vrot.lane.b32.xlu1 %v395_v29, %s1943_s26  ;;  %v116_v28 = vld [vmem:[%s2676_s12 + $0x30] sm:$0xff]  ;;  %v117_v29 = vld [vmem:[%s2676_s12 + $0x38] sm:$0xff] }
 0x237   :  { %v2391_v31 = vpack.c.bf16 %v117_v29, %v116_v28  ;;  %v769_v28 = vld [vmem:[%s2671_s7 + $0xb0] sm:$0xff]  ;;  %v770_v29 = vld [vmem:[%s2671_s7 + $0xb8] sm:$0xff] }
 0x23a   :  { %400 = vrot.lane.b32.xlu1 %v399_v32, %s1944_s28  ;;  %89 = vrot.lane.b32.xlu0 %v60_v33, %s1945_s29  ;;  %v119_v32 = vld [vmem:[%s2676_s12 + $0x48] sm:$0xff] }
 0x23e   :  { %63 = vrot.lane.b32.xlu1 %v59_v34, %s1943_s26 }
 0x242   :  { %65 = vrot.lane.b32.xlu1 %v60_v33, %s1943_s26 }
 0x246   :  { %69 = vrot.lane.b32.xlu1 %v59_v34, %s1944_s28 }
 0x24a   :  { %71 = vrot.lane.b32.xlu1 %v60_v33, %s1944_s28 }
 0x24e   :  { %75 = vrot.lane.b32.xlu1 %v59_v34, %s1942_s25 }
 0x252   :  { %77 = vrot.lane.b32.xlu1 %v60_v33, %s1942_s25 }
 0x256   :  { %81 = vrot.lane.b32.xlu1 %v59_v34, %s1946_s1 }
 0x25a   :  { %408 = vrot.lane.b32.xlu1 %v407_v35, %s1946_s1  ;;  %v121_v35 = vld [vmem:[%s2676_s12 + $0x58] sm:$0xff] }
 0x25e   :  { %412 = vrot.lane.b32.xlu1 %v411_v36, %s1945_s29 }
 0x262   :  { %83 = vrot.lane.b32.xlu1 %v60_v33, %s1946_s1 }
 0x266   :  { %87 = vrot.lane.b32.xlu1 %v59_v34, %s1945_s29 }
 0x2a8   :  { %v397_v43 = vpop.permute.xlu1 %396  ;;  %v405_v57 = vpop.permute.xlu0 %404 }
 0x2a9   :  { %v415_v54 = vsel %vm93_vm2, %v378_v26, %v397_v43  ;;  %v115_v26 = vld [vmem:[%s2676_s12 + $0x28] sm:$0xff] }
 0x2aa   :  { %v2379_v27 = vpack.c.bf16 %v115_v26, %v114_v25  ;;  %v768_v25 = vld [vmem:[%s2671_s7 + $0xa8] sm:$0xff] }
 0x2ac   :  { %v401_v44 = vpop.permute.xlu1 %400  ;;  %v90_v2 = vpop.permute.xlu0 %89  ;;  %1723 = vmatprep.subr.bf16.mxu1 %v2379_v27 }
 0x2ad   :  { %v416_v55 = vsel %vm96_vm3, %v415_v54, %v401_v44  ;;  %1725 = vmatpush3.bf16.msra.mxu1 %v2379_v27  ;;  %v751_v54 = vld [vmem:[%s2671_s7 + $0x20] sm:$0xff] }
 0x2ae   :  { %v417_v59 = vsel %vm99_vm4, %v416_v55, %v405_v57  ;;  %1727 = vmatprep.subr.bf16.mxu1 %v2391_v31  ;;  %v752_v55 = vld [vmem:[%s2671_s7 + $0x28] sm:$0xff]  ;;  %v753_v57 = vld [vmem:[%s2671_s7 + $0x30] sm:$0xff] }
 0x2b0   :  { %v64_v45 = vpop.permute.xlu1 %63 }
 0x2b1   :  { %v94_v9 = vsel %vm93_vm2, %v59_v34, %v64_v45  ;;  %v120_v34 = vld [vmem:[%s2676_s12 + $0x50] sm:$0xff]  ;;  %1729 = vmatpush3.bf16.msra.mxu1 %v2391_v31 }
 0x2b2   :  { %v2408_v36 = vpack.c.bf16 %v121_v35, %v120_v34  ;;  %v778_v34 = vld [vmem:[%s2673_s9 + $0x8] sm:$0xff]  ;;  %v779_v35 = vld [vmem:[%s2673_s9 + $0x10] sm:$0xff] }
 0x2b4   :  { %v66_v46 = vpop.permute.xlu1 %65 }
 0x2b5   :  { %v95_v63 = vsel %vm93_vm2, %v60_v33, %v66_v46  ;;  %v2398_v33 = vpack.c.bf16 %v119_v32, %v118_v30  ;;  %v1796_v30 = vpack.c.bf16 %v770_v29, %v769_v28  ;;  %v777_v32 = vld [vmem:[%s2673_s9] sm:$0xff]  ;;  %v784_v29 = vld [vmem:[%s2674_s10 + $0x8] sm:$0xff] }
 0x2b7   :  { %1731 = vmatprep.subr.bf16.mxu1 %v2398_v33 }
 0x2b8   :  { %v70_v47 = vpop.permute.xlu1 %69  ;;  %1733 = vmatpush3.bf16.msra.mxu1 %v2398_v33 }
 0x2b9   :  { %v97_v11 = vsel %vm96_vm3, %v94_v9, %v70_v47  ;;  %1735 = vmatprep.subr.bf16.mxu1 %v2408_v36  ;;  %v747_v47 = vld [vmem:[%s2671_s7] sm:$0xff] }
 0x2bc   :  { %v72_v48 = vpop.permute.xlu1 %71  ;;  %1737 = vmatpush3.bf16.msra.mxu1 %v2408_v36 }
 0x2bd   :  { %v98_v1 = vsel %vm96_vm3, %v95_v63, %v72_v48  ;;  %1762 = vmatprep.subr.bf16.mxu1 %v1941_v6  ;;  %v748_v48 = vld [vmem:[%s2671_s7 + $0x8] sm:$0xff] }
 0x2c0   :  { %v76_v49 = vpop.permute.xlu1 %75 }
 0x2c1   :  { %v100_v14 = vsel %vm99_vm4, %v97_v11, %v76_v49  ;;  %v749_v49 = vld [vmem:[%s2671_s7 + $0x10] sm:$0xff]  ;;  %v759_v11 = vld [vmem:[%s2671_s7 + $0x60] sm:$0xff] }
 0x2c4   :  { %v78_v50 = vpop.permute.xlu1 %77 }
 0x2c5   :  { %v101_v4 = vsel %vm99_vm4, %v98_v1, %v78_v50  ;;  %v1763_v50 = vpack.c.bf16 %v748_v48, %v747_v47  ;;  %v758_v1 = vld [vmem:[%s2671_s7 + $0x58] sm:$0xff] }
 0x2c8   :  { %v82_v52 = vpop.permute.xlu1 %81 }
 0x2c9   :  { %v103_v16 = vsel %vm102_vm1, %v100_v14, %v82_v52  ;;  %v1766_v52 = vpack.c.bf16 %v750_v51, %v749_v49 }
 0x2cc   :  { %v409_v56 = vpop.permute.xlu1 %408 }
 0x2cd   :  { %v418_v60 = vsel %vm102_vm1, %v417_v59, %v409_v56  ;;  %v1769_v56 = vpack.c.bf16 %v752_v55, %v751_v54  ;;  %v754_v59 = vld [vmem:[%s2671_s7 + $0x38] sm:$0xff] }
 0x2d0   :  { %v413_v61 = vpop.permute.xlu1 %412 }
 0x2d1   :  { %v419_v62 = vsel %vm105_vm5, %v418_v60, %v413_v61  ;;  %v1772_v60 = vpack.c.bf16 %v754_v59, %v753_v57  ;;  %v755_v61 = vld [vmem:[%s2671_s7 + $0x40] sm:$0xff] }
 0x2d2   :  { %v423_v0 = vrot.slane %v419_v62, %v2343_v58  ;;  %v756_v62 = vld [vmem:[%s2671_s7 + $0x48] sm:$0xff] }
 0x2d3   :  { %v1775_v63 = vpack.c.bf16 %v756_v62, %v755_v61 }
 0x2d4   :  { %v491_v5 = vadd.f32 %v2296_v19, %v423_v0  ;;  %v496_v7 = vadd.f32 %v2298_v23, %v423_v0  ;;  %v84_v8 = vpop.permute.xlu1 %83  ;;  %v757_v0 = vld [vmem:[%s2671_s7 + $0x50] sm:$0xff] }
 0x2d5   :  { %v104_v10 = vsel %vm102_vm1, %v101_v4, %v84_v8 }
 0x2d6   :  { %v2358_v12 = vsel %vm105_vm5, %v104_v10, %v90_v2  ;;  %vm500_vm7 = vcmp.gt.f32.partialorder %v496_v7, 0.0  ;;  %v502_v13 = vmul.f32 0.2, %v496_v7  ;;  %vm499_vm9 = vcmp.gt.f32.partialorder %v491_v5, 0.0 }
 0x2d7   :  { %vm109_vm8 = vcmp.gt.f32.partialorder %v2358_v12, 0.0  ;;  %v501_v15 = vmul.f32 0.2, %v491_v5  ;;  %v1778_v2 = vpack.c.bf16 %v758_v1, %v757_v0 }
 0x2d8   :  { %v88_v17 = vpop.permute.xlu1 %87  ;;  %v504_v18 = vsel %vm500_vm7, %v496_v7, %v502_v13  ;;  %v760_v13 = vld [vmem:[%s2671_s7 + $0x68] sm:$0xff] }
 0x2d9   :  { %v2364_v19 = vsel %vm105_vm5, %v103_v16, %v88_v17  ;;  %v506_v20 = vsel %vm109_vm8, %v504_v18, -1e+30  ;;  %v503_v22 = vsel %vm499_vm9, %v491_v5, %v501_v15  ;;  %v1781_v14 = vpack.c.bf16 %v760_v13, %v759_v11  ;;  %v761_v15 = vld [vmem:[%s2671_s7 + $0x70] sm:$0xff]  ;;  %v763_v17 = vld [vmem:[%s2671_s7 + $0x80] sm:$0xff]  ;;  %v764_v18 = vld [vmem:[%s2671_s7 + $0x88] sm:$0xff] }
 0x2da   :  { %vm108_vm10 = vcmp.gt.f32.partialorder %v2364_v19, 0.0  ;;  %v511_v21 = vsel %vm507_vm6, %v506_v20, -inf  ;;  %v781_v13 = vld [vmem:[%s2673_s9 + $0x20] sm:$0xff] }
 0x2db   :  { %512 = vmax.xlane.f32.xlu0 %v511_v21  ;;  %v505_v23 = vsel %vm108_vm10, %v503_v22, -1e+30  ;;  %v765_v21 = vld [vmem:[%s2671_s7 + $0x90] sm:$0xff]  ;;  %v766_v22 = vld [vmem:[%s2671_s7 + $0x98] sm:$0xff]  ;;  %v1301_v19 = vld [vmem:[%s2677_s13] sm:$0xff] }
 0x2dc   :  { %v508_v24 = vsel %vm507_vm6, %v505_v23, -inf }
 0x2dd   :  { %509 = vmax.xlane.f32.xlu1 %v508_v24  ;;  %v767_v24 = vld [vmem:[%s2671_s7 + $0xa0] sm:$0xff] }
 0x2de   :  { %v1793_v26 = vpack.c.bf16 %v768_v25, %v767_v24  ;;  %v774_v24 = vld [vmem:[%s2672_s8 + $0x18] sm:$0xff]  ;;  %v775_v25 = vld [vmem:[%s2672_s8 + $0x20] sm:$0xff] }
 0x368   :  { %v513_v37 = vpop.xlane.xlu0 %512 }
 0x369   :  { %v515_v38 = vsub.f32 %v506_v20, %v513_v37  ;;  %v1787_v20 = vpack.c.bf16 %v764_v18, %v763_v17  ;;  %v1798_v37 = vpack.c.bf16 %v778_v34, %v777_v32  ;;  %v783_v18 = vld [vmem:[%s2674_s10] sm:$0xff]  ;;  %v786_v34 = vld [vmem:[%s2674_s10 + $0x18] sm:$0xff] }
 0x36a   :  { %v510_v39 = vpop.xlane.xlu1 %509  ;;  %v791_v32 = vld [vmem:[%s2674_s10 + $0x40] sm:$0xff] }
 0x36b   :  { %v514_v41 = vsub.f32 %v505_v23, %v510_v39  ;;  %v518_v43 = vmul.f32 1.442695, %v515_v38  ;;  %v1790_v23 = vpack.c.bf16 %v766_v22, %v765_v21  ;;  %v780_v38 = vld [vmem:[%s2673_s9 + $0x18] sm:$0xff]  ;;  %1799 = vmatprep.subr.bf16.mxu0 %v1798_v37  ;;  %v785_v21 = vld [vmem:[%s2674_s10 + $0x10] sm:$0xff]  ;;  %v787_v22 = vld [vmem:[%s2674_s10 + $0x20] sm:$0xff] }
 0x36c   :  { %v1802_v39 = vpack.c.bf16 %v780_v38, %v779_v35  ;;  %v788_v35 = vld [vmem:[%s2674_s10 + $0x28] sm:$0xff] }
 0x36d   :  { %v516_v44 = vmul.f32 1.442695, %v514_v41  ;;  %v636_v41 = vsub.s32 1, %v2338_v53 }
 0x36f   :  { %1892 = vpow2.f32 %v516_v44 }
 0x370   :  { %1894 = vpow2.f32 %v518_v43 }
 0x379   :  { %v1893_v45 = vpop.eup %1892 }
 0x37a   :  { %v1895_v46 = vpop.eup %1894  ;;  %1540 = vmatprep.mubr.msk.f32.mxu1 %vm507_vm6, %v1893_v45 }
 0x37b   :  { %1541 = vmatmul.mubr.msk.f32.vlgmr.msra.gmra.mrb[4].mxu1 %vm507_vm6, %v1895_v46 }
 0x37c   :  { %1764 = vmatpush1.bf16.msra.mxu1 %v1763_v50 }
 0x37d   :  { %1765 = vmatprep.subr.bf16.mxu1 %v1941_v6 }
 0x380   :  { %1767 = vmatpush1.bf16.msra.mxu1 %v1766_v52 }
 0x381   :  { %1768 = vmatprep.subr.bf16.mxu1 %v1941_v6 }
 0x384   :  { %1770 = vmatpush1.bf16.msra.mxu1 %v1769_v56 }
 0x385   :  { %1771 = vmatprep.subr.bf16.mxu1 %v1941_v6 }
 0x388   :  { %1773 = vmatpush1.bf16.msra.mxu1 %v1772_v60 }
 0x389   :  { %1774 = vmatprep.subr.bf16.mxu1 %v1941_v6 }
 0x38c   :  { %1776 = vmatpush1.bf16.msra.mxu1 %v1775_v63 }
 0x38d   :  { %1777 = vmatprep.subr.bf16.mxu1 %v1941_v6 }
 0x390   :  { %1779 = vmatpush1.bf16.msra.mxu1 %v1778_v2 }
 0x391   :  { %1780 = vmatprep.subr.bf16.mxu1 %v1941_v6 }
 0x394   :  { %1782 = vmatpush1.bf16.msra.mxu1 %v1781_v14  ;;  %v782_v14 = vld [vmem:[%s2673_s9 + $0x28] sm:$0xff] }
 0x395   :  { %1783 = vmatprep.subr.bf16.mxu1 %v1941_v6 }
 0x44e   :  { %v1542_v4 = vpop.f32.mrb[4].mxu1 }
 0x44f   :  { %v592_v5 = vpop.f32.mrb[5].mxu1 }
 0x450   :  { %1896 = vrcp.f32 %v592_v5 }
 0x451   :  { %1898 = vrcp.f32 %v1542_v4 }
 0x45a   :  { %v1897_v7 = vpop.eup %1896 }
 0x45b   :  { %v603_v8 = vmul.f32 %v1897_v7, %v1893_v45  ;;  %v1899_v9 = vpop.eup %1898 }
 0x45c   :  { %v604_v10 = vmul.f32 %v1899_v9, %v1895_v46 }
 0x45d   :  { %1426 = vmatmul.mubr.msk.f32.vlgmr.msra.gmra.mrb[8].mxu0 %vm507_vm6, %v603_v8 }
 0x45e   :  { %716 = vmatprep.mubr.f32.mxu0 %v1940_v3  ;;  %v762_v3 = vld [vmem:[%s2671_s7 + $0x78] sm:$0xff]  ;;  %1801 = vmatpush3.bf16.msra.mxu0 %v1798_v37 }
 0x45f   :  { %v1784_v16 = vpack.c.bf16 %v762_v3, %v761_v15  ;;  %1803 = vmatprep.subr.bf16.mxu0 %v1802_v39  ;;  %v1806_v15 = vpack.c.bf16 %v782_v14, %v781_v13  ;;  %v771_v3 = vld [vmem:[%s2672_s8] sm:$0xff]  ;;  %v790_v37 = vld [vmem:[%s2674_s10 + $0x38] sm:$0xff] }
 0x461   :  { %1427 = vmatmul.mubr.msk.f32.gmra.mrb[10].mxu0 %vm507_vm6, %v604_v10  ;;  %1785 = vmatpush1.bf16.msra.mxu1 %v1784_v16  ;;  %v772_v16 = vld [vmem:[%s2672_s8 + $0x8] sm:$0xff] }
 0x462   :  { %1786 = vmatprep.subr.bf16.mxu1 %v1941_v6  ;;  %1805 = vmatpush3.bf16.msra.mxu0 %v1802_v39  ;;  %v1810_v17 = vpack.c.bf16 %v772_v16, %v771_v3 }
 0x463   :  { %1807 = vmatprep.subr.bf16.mxu0 %v1806_v15 }
 0x465   :  { %1788 = vmatpush1.bf16.msra.mxu1 %v1787_v20  ;;  %v773_v20 = vld [vmem:[%s2672_s8 + $0x10] sm:$0xff] }
 0x466   :  { %1789 = vmatprep.subr.bf16.mxu1 %v1941_v6  ;;  %1809 = vmatpush3.bf16.msra.mxu0 %v1806_v15  ;;  %v1814_v38 = vpack.c.bf16 %v774_v24, %v773_v20 }
 0x467   :  { %1811 = vmatprep.subr.bf16.mxu0 %v1810_v17 }
 0x469   :  { %1791 = vmatpush1.bf16.msra.mxu1 %v1790_v23 }
 0x46a   :  { %1792 = vmatprep.subr.bf16.mxu1 %v1941_v6 }
 0x46d   :  { %1794 = vmatpush1.bf16.msra.mxu1 %v1793_v26  ;;  %v776_v26 = vld [vmem:[%s2672_s8 + $0x28] sm:$0xff] }
 0x46e   :  { %1795 = vmatprep.subr.bf16.mxu1 %v1941_v6  ;;  %v196_v6 = vld [vmem:[%s2670_s6] sm:$0x3] }
 0x46f   :  { %v633_v43 = vrot.slane %v196_v6, %v2343_v58  ;;  %v637_v44 = vrot.slane %v196_v6, %v636_v41  ;;  %v1818_v6 = vpack.c.bf16 %v776_v26, %v775_v25  ;;  %v792_v41 = vld [vmem:[%s2674_s10 + $0x48] sm:$0xff] }
 0x471   :  { %1797 = vmatpush1.bf16.msra.mxu1 %v1796_v30  ;;  %v789_v30 = vld [vmem:[%s2674_s10 + $0x30] sm:$0xff] }
 0x530   :  { %v712_v45 = vpop.f32.mrb[8].mxu0 }
 0x531   :  { %v713_v46 = vadd.f32 %v712_v45, %v633_v43  ;;  %v714_v47 = vpop.f32.mrb[9].mxu0 }
 0x532   :  { %v715_v48 = vadd.f32 %v714_v47, %v637_v44 }
 0x533   :  { %v727_v49 = vmin.f32 %v713_v46, 0.0  ;;  %vm723_vm12 = vcmp.gt.f32.partialorder %v713_v46, 0.0 }
 0x534   :  { %v728_v50 = vmin.f32 %v715_v48, 0.0  ;;  %v718_v51 = vpop.f32.mrb[10].mxu0  ;;  %vm724_vm11 = vcmp.gt.f32.partialorder %v715_v48, 0.0 }
 0x535   :  { %v731_v52 = vmul.f32 1.442695, %v727_v49  ;;  %v719_v54 = vadd.f32 %v718_v51, %v633_v43  ;;  %v720_v55 = vpop.f32.mrb[11].mxu0  ;;  %v793_v43 = vld [vmem:[%s2674_s10 + $0x50] sm:$0xff] }
 0x536   :  { %v733_v56 = vmul.f32 1.442695, %v728_v50  ;;  %v721_v57 = vadd.f32 %v720_v55, %v637_v44  ;;  %v794_v44 = vld [vmem:[%s2674_s10 + $0x58] sm:$0xff] }
 0x537   :  { %1900 = vpow2.f32 %v731_v52  ;;  %v729_v59 = vmin.f32 %v719_v54, 0.0  ;;  %vm725_vm14 = vcmp.gt.f32.partialorder %v719_v54, 0.0 }
 0x538   :  { %1902 = vpow2.f32 %v733_v56  ;;  %v730_v60 = vmin.f32 %v721_v57, 0.0  ;;  %vm726_vm13 = vcmp.gt.f32.partialorder %v721_v57, 0.0 }
 0x539   :  { %v735_v53 = vmul.f32 1.442695, %v729_v59 }
 0x53a   :  { %v737_v61 = vmul.f32 1.442695, %v730_v60 }
 0x53b   :  { %1904 = vpow2.f32 %v735_v53 }
 0x53c   :  { %1906 = vpow2.f32 %v737_v61 }
 0x541   :  { %v1901_v62 = vpop.eup %1900 }
 0x542   :  { %v1903_v63 = vpop.eup %1902  ;;  %v1428_v0 = vadd.f32 -1.0, %v1901_v62 }
 0x543   :  { %v1429_v1 = vadd.f32 -1.0, %v1903_v63 }
 0x544   :  { %v743_v7 = vsel %vm723_vm12, %v713_v46, %v1428_v0 }
 0x545   :  { %v1905_v2 = vpop.eup %1904  ;;  %v744_v4 = vsel %vm724_vm11, %v715_v48, %v1429_v1 }
 0x546   :  { %v1907_v5 = vpop.eup %1906  ;;  %1432 = vmatprep.mubr.msk.f32.mxu1 %vm102_vm1, %v744_v4  ;;  %v1430_v8 = vadd.f32 -1.0, %v1905_v2 }
 0x547   :  { %867 = vmatmul.mubr.f32.vlgmr.msra.gmra.mrb[6].mxu1 %v743_v7  ;;  %v1431_v9 = vadd.f32 -1.0, %v1907_v5 }
 0x548   :  { %v745_v11 = vsel %vm725_vm14, %v719_v54, %v1430_v8 }
 0x549   :  { %v746_v10 = vsel %vm726_vm13, %v721_v57, %v1431_v9 }
 0x54a   :  { %1433 = vmatprep.mubr.msk.f32.mxu1 %vm102_vm1, %v746_v10 }
 0x54b   :  { %872 = vmatmul.mubr.f32.gmra.mrb[8].mxu1 %v745_v11 }
 0x61a   :  { %v868_v23 = vpop.f32.mrb[6].mxu1 }
 0x61b   :  { %v870_v28 = vpop.f32.mrb[7].mxu1  ;;  %1555 = vmatprep.mubr.msk.f32.mxu0 %vm99_vm4, %v868_v23  ;;  %v1200_v39 = vmul.f32 %v868_v23, %v783_v18  ;;  %v1202_v46 = vmul.f32 %v868_v23, %v785_v21  ;;  %v1204_v47 = vmul.f32 %v868_v23, %v787_v22  ;;  %v1206_v48 = vmul.f32 %v868_v23, %v789_v30 }
 0x61c   :  { %v1208_v49 = vmul.f32 %v868_v23, %v791_v32  ;;  %v1210_v57 = vmul.f32 %v868_v23, %v793_v43  ;;  %v1304_v43 = vld [vmem:[%s2677_s13 + $0x18] sm:$0xff] }
 0x61e   :  { %v873_v45 = vpop.f32.mrb[8].mxu1 }
 0x61f   :  { %v875_v50 = vpop.f32.mrb[9].mxu1  ;;  %1556 = vmatmul.mubr.msk.f32.vlgmr.msra.gmra.mrb[12].mxu0 %vm99_vm4, %v873_v45  ;;  %v1201_v51 = vmul.f32 %v873_v45, %v784_v29  ;;  %v1203_v52 = vmul.f32 %v873_v45, %v786_v34  ;;  %v1205_v54 = vmul.f32 %v873_v45, %v788_v35  ;;  %v1207_v55 = vmul.f32 %v873_v45, %v790_v37 }
 0x620   :  { %1813 = vmatpush3.bf16.msra.mxu0 %v1810_v17  ;;  %1570 = vmatprep.mubr.msk.f32.mxu0 %vm99_vm4, %v868_v23  ;;  %v1209_v56 = vmul.f32 %v873_v45, %v792_v41  ;;  %v1211_v59 = vmul.f32 %v873_v45, %v794_v44 }
 0x621   :  { %1815 = vmatprep.subr.bf16.mxu0 %v1814_v38  ;;  %v1846_v60 = vpack.c.bf16 %v1201_v51, %v1200_v39  ;;  %v1850_v53 = vpack.c.bf16 %v1203_v52, %v1202_v46  ;;  %v1854_v61 = vpack.c.bf16 %v1205_v54, %v1204_v47  ;;  %v1858_v62 = vpack.c.bf16 %v1207_v55, %v1206_v48  ;;  %v1302_v39 = vld [vmem:[%s2677_s13 + $0x8] sm:$0xff]  ;;  %v1305_v51 = vld [vmem:[%s2677_s13 + $0x20] sm:$0xff] }
 0x622   :  { %v1862_v63 = vpack.c.bf16 %v1209_v56, %v1208_v49  ;;  %v1866_v0 = vpack.c.bf16 %v1211_v59, %v1210_v57  ;;  %v1870_v41 = vpack.c.bf16 %v1302_v39, %v1301_v19  ;;  %v1306_v52 = vld [vmem:[%s2677_s13 + $0x28] sm:$0xff]  ;;  %v1440_v55 = vld [vmem:[%s2675_s11] ss:$0 sm:$0xff] }
 0x623   :  { %1847 = vmatprep.subr.bf16.mxu1 %v1846_v60  ;;  %v1878_v54 = vpack.c.bf16 %v1306_v52, %v1305_v51 }
 0x624   :  { %1817 = vmatpush3.bf16.msra.mxu0 %v1814_v38  ;;  %1849 = vmatpush3.bf16.msra.mxu1 %v1846_v60 }
 0x625   :  { %1851 = vmatprep.subr.bf16.mxu1 %v1850_v53  ;;  %1819 = vmatprep.subr.bf16.mxu0 %v1818_v6 }
 0x628   :  { %1821 = vmatpush3.bf16.msra.mxu0 %v1818_v6  ;;  %1853 = vmatpush3.bf16.msra.mxu1 %v1850_v53  ;;  %v1303_v6 = vld [vmem:[%s2677_s13 + $0x10] sm:$0xff]  ;;  %s1947_s13 = smov [#allocation2]  }
 0x629   :  { %1855 = vmatprep.subr.bf16.mxu1 %v1854_v61  ;;  %1823 = vmatprep.subr.bf16.mxu0 %v2325_v40  ;;  %v1874_v44 = vpack.c.bf16 %v1304_v43, %v1303_v6  ;;  %s1405_s3 = sshll.u32 %s1947_s13, 4  ;;  %s1406_s3 = int_to_ptr.vmem [resolvable:$true] %s1405_s3 }
 0x62a   :  { %s1916_s21 = scalar_lea.vmem %s1406_s3, 256  ;;  %p1921_p1 = scmp.lt.s32.totalorder %s1406_s3, %s1406_s3 }
 0x62b   :  { %1571 = vmatmul.mubr.msk.f32.vlgmr.msra.gmra.mrb[14].mxu0 %vm99_vm4, %v873_v45  ;;  %p1917_p0 = scmp.ne.s32.totalorder %s1406_s3, %s1916_s21  ;;  %p1922_p2 = scmp.lt.s32.totalorder %s1916_s21, %s1916_s21 }
 0x62c   :  { %1857 = vmatpush3.bf16.msra.mxu1 %v1854_v61  ;;  %1825 = vmatpush3.bf16.msra.mxu0 %v2325_v40 }
 0x62d   :  { %1859 = vmatprep.subr.bf16.mxu1 %v1858_v62  ;;  %1827 = vmatprep.subr.bf16.mxu0 %v2330_v42  ;;  %p1923_p3 = por %p1922_p2, %p1921_p1 }
 0x62f   :  { %p1924_p4 = pnand %p1923_p3, %p1917_p0 }
 0x630   :  { %1861 = vmatpush3.bf16.msra.mxu1 %v1858_v62  ;;  %1829 = vmatpush3.bf16.msra.mxu0 %v2330_v42 }
 0x631   :  { %1863 = vmatprep.subr.bf16.mxu1 %v1862_v63  ;;  %1831 = vmatprep.subr.bf16.mxu0 %v2379_v27 }
 0x634   :  { %1865 = vmatpush3.bf16.msra.mxu1 %v1862_v63  ;;  %1833 = vmatpush3.bf16.msra.mxu0 %v2379_v27 }
 0x635   :  { %1867 = vmatprep.subr.bf16.mxu1 %v1866_v0  ;;  %1835 = vmatprep.subr.bf16.mxu0 %v2391_v31 }
 0x638   :  { %1869 = vmatpush3.bf16.msra.mxu1 %v1866_v0  ;;  %1837 = vmatpush3.bf16.msra.mxu0 %v2391_v31 }
 0x639   :  { %1839 = vmatprep.subr.bf16.mxu0 %v2398_v33 }
 0x63c   :  { %1841 = vmatpush3.bf16.msra.mxu0 %v2398_v33 }
 0x63d   :  { %1843 = vmatprep.subr.bf16.mxu0 %v2408_v36 }
 0x640   :  { %1845 = vmatpush3.bf16.msra.mxu0 %v2408_v36 }
 0x641   :  { %1871 = vmatprep.subr.bf16.mxu0 %v1870_v41 }
 0x6f2   :  { %v1557_v40 = vpop.f32.mrb[12].mxu0 }
 0x6f3   :  { %v949_v42 = vpop.f32.mrb[13].mxu0 }
 0x6f4   :  { %958 = vxpose.xlu0.b32.start [1/2] (short) (narrow) %v949_v42, 8 }
 0x6f8   :  { %959 = vxpose.xlu0.b32.end [2/2] (short) (narrow) %v1557_v40, 8 }
 0x6fe   :  { %v1572_v1 = vpop.f32.mrb[14].mxu0 }
 0x6ff   :  { %v1086_v27 = vpop.f32.mrb[15].mxu0 }
 0x774   :  { %v974_v2 = vpop.trf.xlu0 }
 0x775   :  { %v991_v4 = vrot.slane %v974_v2, 1  ;;  %v995_v5 = vrot.slane %v974_v2, 2  ;;  %v999_v31 = vrot.slane %v974_v2, 3  ;;  %v1003_v33 = vrot.slane %v974_v2, 4 }
 0x776   :  { %v1007_v36 = vrot.slane %v974_v2, 5 }
 0x777   :  { %992 = vrot.lane.b32.xlu1 %v991_v4, %s1943_s26 }
 0x77b   :  { %996 = vrot.lane.b32.xlu1 %v995_v5, %s1944_s28 }
 0x77f   :  { %1000 = vrot.lane.b32.xlu1 %v999_v31, %s1942_s25 }
 0x783   :  { %1004 = vrot.lane.b32.xlu1 %v1003_v33, %s1946_s1 }
 0x787   :  { %1008 = vrot.lane.b32.xlu1 %v1007_v36, %s1945_s29 }
 0x7e9   :  { %v993_v7 = vpop.permute.xlu1 %992 }
 0x7ea   :  { %v1011_v11 = vsel %vm93_vm2, %v974_v2, %v993_v7 }
 0x7ed   :  { %v997_v8 = vpop.permute.xlu1 %996 }
 0x7ee   :  { %v1012_v13 = vsel %vm96_vm3, %v1011_v11, %v997_v8 }
 0x7f1   :  { %v1001_v9 = vpop.permute.xlu1 %1000 }
 0x7f2   :  { %v1013_v14 = vsel %vm99_vm4, %v1012_v13, %v1001_v9 }
 0x7f5   :  { %v1005_v10 = vpop.permute.xlu1 %1004 }
 0x7f6   :  { %v1014_v15 = vsel %vm102_vm1, %v1013_v14, %v1005_v10 }
 0x7f9   :  { %v1009_v3 = vpop.permute.xlu1 %1008 }
 0x7fa   :  { %v1015_v16 = vsel %vm105_vm5, %v1014_v15, %v1009_v3 }
 0x7fb   :  { %v1019_v17 = vrot.slane %v1015_v16, %v2343_v58 }
 0x7fd   :  { %v1087_v18 = vadd.f32 %v1086_v27, %v1019_v17  ;;  %v1092_v20 = vadd.f32 %v1572_v1, %v1019_v17 }
 0x7ff   :  { %vm1096_vm15 = vcmp.gt.f32.partialorder %v1092_v20, 0.0  ;;  %v1098_v21 = vmul.f32 0.2, %v1092_v20  ;;  %vm1095_vm0 = vcmp.gt.f32.partialorder %v1087_v18, 0.0  ;;  %v1097_v22 = vmul.f32 0.2, %v1087_v18 }
 0x801   :  { %v1100_v23 = vsel %vm1096_vm15, %v1092_v20, %v1098_v21  ;;  %v1099_v24 = vsel %vm1095_vm0, %v1087_v18, %v1097_v22 }
 0x802   :  { %v1102_v25 = vsel %vm109_vm8, %v1100_v23, -1e+30  ;;  %v1101_v26 = vsel %vm108_vm10, %v1099_v24, -1e+30 }
 0x803   :  { %v1106_v28 = vsel %vm507_vm6, %v1102_v25, -inf  ;;  %v1103_v29 = vsel %vm507_vm6, %v1101_v26, -inf }
 0x804   :  { %1107 = vmax.xlane.f32.xlu0 %v1106_v28  ;;  %1104 = vmax.xlane.f32.xlu1 %v1103_v29 }
 0x891   :  { %v1108_v58 = vpop.xlane.xlu0 %1107  ;;  %v1105_v30 = vpop.xlane.xlu1 %1104 }
 0x892   :  { %v1110_v32 = vsub.f32 %v1102_v25, %v1108_v58  ;;  %v1109_v34 = vsub.f32 %v1101_v26, %v1105_v30 }
 0x894   :  { %v1113_v35 = vmul.f32 1.442695, %v1110_v32  ;;  %v1111_v37 = vmul.f32 1.442695, %v1109_v34 }
 0x896   :  { %1908 = vpow2.f32 %v1113_v35 }
 0x897   :  { %1910 = vpow2.f32 %v1111_v37 }
 0x8a0   :  { %v1909_v38 = vpop.eup %1908 }
 0x8a1   :  { %v1911_v12 = vpop.eup %1910 }
 0x8a2   :  { %1597 = vmatprep.mubr.msk.f32.mxu0 %vm507_vm6, %v1911_v12 }
 0x8a3   :  { %1598 = vmatmul.mubr.msk.f32.vlgmr.msra.gmra.mrb[16].mxu0 %vm507_vm6, %v1909_v38 }
 0x8a4   :  { %1873 = vmatpush3.bf16.msra.mxu0 %v1870_v41 }
 0x8a5   :  { %1875 = vmatprep.subr.bf16.mxu0 %v1874_v44 }
 0x8a8   :  { %1877 = vmatpush3.bf16.msra.mxu0 %v1874_v44 }
 0x8a9   :  { %1879 = vmatprep.subr.bf16.mxu0 %v1878_v54 }
 0x8ac   :  { %1881 = vmatpush3.bf16.msra.mxu0 %v1878_v54 }
 0x976   :  { %v1599_v45 = vpop.f32.mrb[16].mxu0 }
 0x977   :  { %1912 = vrcp.f32 %v1599_v45  ;;  %v1187_v46 = vpop.f32.mrb[17].mxu0 }
 0x978   :  { %1914 = vrcp.f32 %v1187_v46 }
 0x981   :  { %v1913_v47 = vpop.eup %1912 }
 0x982   :  { %v1915_v48 = vpop.eup %1914  ;;  %v1199_v50 = vmul.f32 %v1913_v47, %v1909_v38 }
 0x983   :  { %v1198_v49 = vmul.f32 %v1915_v48, %v1911_v12 }
 0x985   :  { %1624 = vmatprep.mubr.msk.f32.mxu1 %vm507_vm6, %v1198_v49 }
 0x986   :  { %1625 = vmatmul.mubr.msk.f32.vlgmr.msra.gmra.mrb[10].mxu1 %vm507_vm6, %v1199_v50 }
 0xa59   :  { %v1626_v56 = vpop.f32.mrb[10].mxu1 }
 0xa5a   :  { %v1296_v57 = vadd.f32 %v1626_v56, %v1440_v55  ;;  %v1290_v59 = vpop.f32.mrb[11].mxu1 }
 0xa5b   :  { %v1291_v60 = vadd.f32 %v1440_v55, %v1290_v59 }
 0xa5c   :  { %1300 = vst.msk [vmem:[#allocation2 + $0x8] sm:$0xff] %vm99_vm4, %v1296_v57 }
 0xa5d   :  { %1299 = vst.msk [vmem:[#allocation2] sm:$0xff] %vm99_vm4, %v1291_v60  ;;  %1639 = vmatprep.mubr.msk.f32.mxu0 %vm99_vm4, %v1291_v60 }
 0xa5e   :  { %1640 = vmatmul.mubr.msk.f32.vlgmr.msra.gmra.mrb[18].mxu0 %vm99_vm4, %v1296_v57 }
 0xa5f   :  { %1927 = shalt.err (!%p1924_p4)
}
 0xa60   :  { %s1928_s22 = scalar_lea.hbm %s2680_s16, 256 }
 0xa61   :  { %p1929_p5 = scmp.ne.s32.totalorder %s2680_s16, %s1928_s22  ;;  %p1932_p6 = scmp.lt.u32.totalorder %s1928_s22, %s2680_s16 }
 0xa63   :  { %p1934_p7 = pnand %p1932_p6, %p1929_p5 }
 0xa65   :  { %1937 = shalt.err (!%p1934_p7)
}
 0xa66   :  { %s1948_s7 = smov 128   ;;  %s1949_s30 = smov 8   ;;  %v1443_v53 = vld [vmem:[%s2678_s14] ss:$0 sm:$0xff]  ;;  %vm1395_vm1 = vcmask 31744  }
 0xa67   :  { %1411 = dma.vmem_to_hbm [thread:$0]  %s1406_s3, 256, %s2680_s16, [#allocation3], %s1948_s7, %s1948_s7, %s1949_s30  }
 0xb31   :  { %v1641_v61 = vpop.f32.mrb[18].mxu0 }
 0xb32   :  { %v1392_v62 = vadd.f32 %v1641_v61, %v1443_v53  ;;  %v1386_v63 = vpop.f32.mrb[19].mxu0 }
 0xb33   :  { %v1387_v0 = vadd.f32 %v1443_v53, %v1386_v63 }
 0xb34   :  { %1397 = vst.msk [vmem:[%s2679_s15 + $0x8] sm:$0xff] %vm1395_vm1, %v1392_v62 }
 0xb35   :  { %1396 = vst.msk [vmem:[%s2679_s15] sm:$0xff] %vm1395_vm1, %v1387_v0 }
 0xb36   :  { %1938 = dma.done.wait [#allocation3], 256  }
 0xb37   :  { %1939 = vsyncadd [#allocation3], 4294967040 }
 0xb38   :  { %1417 = vsyncpa [#allocation3], 1 }

</bundles_post_ra>
